<compile_context>
chip_gen: v7x
topology: tpu7x:2x2x1
jax: 0.10.0
libtpu: 0.0.40
codegen_flags: <defaults>
</compile_context>

<pallas_src>
import jax
import jax.numpy as jnp
from jax.experimental import pallas as pl
from jax.experimental.pallas import tpu as pltpu

CHANNELS = 64
GIN_HIDDEN = 256


def _round_up(x, m):
    return ((x + m - 1) // m) * m


def _pick_tile(n_pad, cap):
    """Largest multiple of 128 <= cap that divides n_pad (n_pad % 128 == 0)."""
    t = min(cap, n_pad)
    t = max(128, t - t % 128)
    while n_pad % t:
        t -= 128
    return t


def _gin_kernel(nat_ref, na_ref,                      # scalar-prefetch (SMEM)
                at_ref, a_ref, x_ref,                 # tiled inputs
                w1o_ref, w1b_ref, b1_ref, w2_ref, b2_ref,   # VMEM-resident weights
                o_ref,                                # output tile
                out_acc, back_acc):                   # f32 VMEM accumulators
    """Grid = (row tiles i [parallel], reduction tiles k [arbitrary])."""
    i = pl.program_id(0)
    k = pl.program_id(1)

    @pl.when(k == 0)
    def _():
        out_acc[...] = jnp.zeros_like(out_acc)
        back_acc[...] = jnp.zeros_like(back_acc)

    # x tile cast to bf16 once per step; A tiles upcast int8 -> bf16 (exact small
    # ints).  MXU runs bf16 x bf16 with f32 accumulation.
    x = x_ref[...].astype(jnp.bfloat16)               # (TK, C)

    @pl.when(nat_ref[i, k] > 0)
    def _():
        # out[i] += sum_s A[s, i] * x[s]  via the pre-built A^T array (no transpose).
        out_acc[...] += jnp.dot(at_ref[...].astype(jnp.bfloat16), x,
                                preferred_element_type=jnp.float32)

    @pl.when(na_ref[i, k] > 0)
    def _():
        # back[i] += sum_t A[i, t] * x[t]
        back_acc[...] += jnp.dot(a_ref[...].astype(jnp.bfloat16), x,
                                 preferred_element_type=jnp.float32)

    @pl.when(k == pl.num_programs(1) - 1)
    def _():
        # MLP epilogue: hidden layer as two 64-wide dots (== cat([out, back]) @ W1),
        # ReLU, output layer.  Runs once per row tile; f32 for accuracy.
        h = (jnp.dot(out_acc[...], w1o_ref[...], preferred_element_type=jnp.float32)
             + jnp.dot(back_acc[...], w1b_ref[...], preferred_element_type=jnp.float32)
             + b1_ref[...])
        h = jnp.maximum(h, 0.0)
        y = jnp.dot(h, w2_ref[...], preferred_element_type=jnp.float32) + b2_ref[...]
        o_ref[...] = y.astype(o_ref.dtype)


def directed_gin_conv(x, edge_index, params, *, tm_cap=512, tk_cap=2048):
    """x: [N, CHANNELS] f32, edge_index: [2, E] int32,
    params = (w1 [2*C, H], b1 [H], w2 [H, C], b2 [C])."""
    n = x.shape[0]
    e = edge_index.shape[1]
    w1, b1, w2, b2 = params

    # Pad only to a multiple of 128; pick rectangular tiles that divide n_pad.
    n_pad = _round_up(max(n, 128), 128)
    tm = _pick_tile(n_pad, tm_cap)
    if n_pad // tm < 2 and n_pad >= 256:
        tm = _pick_tile(n_pad, n_pad // 2)      # >= 2 row tiles -> both v7x TCs busy
    tk = _pick_tile(n_pad, tk_cap)
    num_i = n_pad // tm
    num_k = n_pad // tk

    src = edge_index[0].astype(jnp.int32)
    dst = edge_index[1].astype(jnp.int32)

    # Dense adjacency built DIRECTLY in its int8 storage dtype (exact for edge
    # multiplicity <= 127; hercd graphs have no heavy multi-edges).  A^T is built
    # with a second scatter instead of being transposed, so the kernel only ever
    # does row-major matmuls and each array is streamed from HBM exactly once.
    # TODO(synk): for very sparse graphs (E << N^2) replace this densification with
    # a scalar-prefetch CSR/edge-list kernel (O(E*C) work instead of O(N^2*C)).
    ones_i8 = jnp.ones((e,), jnp.int8)
    a = jnp.zeros((n_pad, n_pad), jnp.int8).at[src, dst].add(ones_i8)
    at = jnp.zeros((n_pad, n_pad), jnp.int8).at[dst, src].add(ones_i8)

    # Per-tile nonzero counts for the block-sparsity fast path (scalar prefetch).
    ones_i32 = jnp.ones((e,), jnp.int32)
    na = jnp.zeros((num_i, num_k), jnp.int32).at[src // tm, dst // tk].add(ones_i32)
    nat = jnp.zeros((num_i, num_k), jnp.int32).at[dst // tm, src // tk].add(ones_i32)

    x_pad = jnp.zeros((n_pad, CHANNELS), jnp.float32).at[:n, :].set(
        x.astype(jnp.float32))

    # Split W1 into the halves that multiply out / back (slicing here is free and
    # removes the in-kernel concat of the two 64-lane aggregates).
    w1o = w1[:CHANNELS, :]
    w1b = w1[CHANNELS:, :]

    # Empty adjacency tiles remap to block (0, 0): consecutive empties reuse the
    # same resident block (no re-DMA), and the compute is skipped via pl.when.
    def at_map(i, k, nat_s, na_s):
        nz = nat_s[i, k] > 0
        return (jnp.where(nz, i, 0), jnp.where(nz, k, 0))

    def a_map(i, k, nat_s, na_s):
        nz = na_s[i, k] > 0
        return (jnp.where(nz, i, 0), jnp.where(nz, k, 0))

    flops = (4 * n_pad * n_pad * CHANNELS
             + 2 * n_pad * 2 * CHANNELS * GIN_HIDDEN
             + 2 * n_pad * GIN_HIDDEN * CHANNELS)
    bytes_accessed = (2 * n_pad * n_pad                          # A + A^T, int8, once each
                      + (num_i + 1) * n_pad * CHANNELS * 4       # x per row tile + y out
                      + 4 * (w1.size + b1.size + w2.size + b2.size))

    grid_spec = pltpu.PrefetchScalarGridSpec(
        num_scalar_prefetch=2,
        grid=(num_i, num_k),
        in_specs=[
            pl.BlockSpec((tm, tk), at_map),                                   # A^T
            pl.BlockSpec((tm, tk), a_map),                                    # A
            pl.BlockSpec((tk, CHANNELS), lambda i, k, nat_s, na_s: (k, 0)),   # x
            pl.BlockSpec((CHANNELS, GIN_HIDDEN), lambda i, k, nat_s, na_s: (0, 0)),
            pl.BlockSpec((CHANNELS, GIN_HIDDEN), lambda i, k, nat_s, na_s: (0, 0)),
            pl.BlockSpec((1, GIN_HIDDEN), lambda i, k, nat_s, na_s: (0, 0)),
            pl.BlockSpec((GIN_HIDDEN, CHANNELS), lambda i, k, nat_s, na_s: (0, 0)),
            pl.BlockSpec((1, CHANNELS), lambda i, k, nat_s, na_s: (0, 0)),
        ],
        out_specs=pl.BlockSpec((tm, CHANNELS), lambda i, k, nat_s, na_s: (i, 0)),
        scratch_shapes=[pltpu.VMEM((tm, CHANNELS), jnp.float32),
                        pltpu.VMEM((tm, CHANNELS), jnp.float32)],
    )

    y = pl.pallas_call(
        _gin_kernel,
        out_shape=jax.ShapeDtypeStruct((n_pad, CHANNELS), jnp.float32),
        grid_spec=grid_spec,
        compiler_params=pltpu.CompilerParams(
            dimension_semantics=("parallel", "arbitrary"),
            vmem_limit_bytes=48 * 1024 * 1024,   # headroom under v7x's 64 MiB/TC
        ),
        cost_estimate=pl.CostEstimate(flops=int(flops), transcendentals=0,
                                      bytes_accessed=int(bytes_accessed)),
    )(nat, na, at, a, x_pad, w1o, w1b, b1.reshape(1, -1), w2, b2.reshape(1, -1))

    return y[:n]


def _reference(x, edge_index, params):
    """Pure-JAX f32 reference matching PyG MessagePassing semantics."""
    src, dst = edge_index[0], edge_index[1]
    out = jnp.zeros_like(x).at[dst].add(x[src])    # source_to_target
    back = jnp.zeros_like(x).at[src].add(x[dst])   # target_to_source
    w1, b1, w2, b2 = params
    h = jnp.maximum(jnp.concatenate([out, back], axis=-1) @ w1 + b1, 0.0)
    return h @ w2 + b2


def _make_params(key):
    k1, k2, k3, k4 = jax.random.split(key, 4)
    w1 = jax.random.normal(k1, (2 * CHANNELS, GIN_HIDDEN), jnp.float32) * 0.05
    b1 = jax.random.normal(k2, (GIN_HIDDEN,), jnp.float32) * 0.05
    w2 = jax.random.normal(k3, (GIN_HIDDEN, CHANNELS), jnp.float32) * 0.05
    b2 = jax.random.normal(k4, (CHANNELS,), jnp.float32) * 0.05
    return (w1, b1, w2, b2)


if __name__ == "__main__":
    key = jax.random.PRNGKey(0)
    kp, kx, ke, kx2, ke2, kx3, ke3 = jax.random.split(key, 7)
    params = _make_params(kp)

    # Aggregation runs on the MXU with x cast to bf16 (f32 accumulation), so use a
    # bf16-appropriate tolerance against the pure-f32 reference.
    RTOL = ATOL = 2e-2

    # 1) Small graph: single-tile path.
    N, E = 8, 16
    x = jax.random.normal(kx, (N, CHANNELS), jnp.float32)
    edge_index = jax.random.randint(ke, (2, E), 0, N, dtype=jnp.int32)
    y = directed_gin_conv(x, edge_index, params)
    jax.block_until_ready(y)
    y_ref = _reference(x, edge_index, params)
    assert y.shape == (N, CHANNELS)
    assert jnp.allclose(y, y_ref, rtol=RTOL, atol=ATOL), "small-graph mismatch"

    # 2) Larger graph: multiple parallel row tiles + reduction accumulator.
    N2, E2 = 600, 4000
    x2 = jax.random.normal(kx2, (N2, CHANNELS), jnp.float32)
    edge_index2 = jax.random.randint(ke2, (2, E2), 0, N2, dtype=jnp.int32)
    y2 = directed_gin_conv(x2, edge_index2, params)
    jax.block_until_ready(y2)
    y2_ref = _reference(x2, edge_index2, params)
    assert y2.shape == (N2, CHANNELS)
    assert jnp.allclose(y2, y2_ref, rtol=RTOL, atol=ATOL), "tiled-graph mismatch"

    # 3) Clustered sparse graph (edges only among nodes 0..149 of 600): most
    #    adjacency tiles are empty, exercising the scalar-prefetch tile-skip path.
    N3, E3 = 600, 512
    x3 = jax.random.normal(kx3, (N3, CHANNELS), jnp.float32)
    edge_index3 = jax.random.randint(ke3, (2, E3), 0, 150, dtype=jnp.int32)
    y3 = directed_gin_conv(x3, edge_index3, params)
    jax.block_until_ready(y3)
    y3_ref = _reference(x3, edge_index3, params)
    assert y3.shape == (N3, CHANNELS)
    assert jnp.allclose(y3, y3_ref, rtol=RTOL, atol=ATOL), "sparse-graph mismatch"

    print("KERNEL_OK")
</pallas_src>

<mosaic_0001>
module attributes {stable_mosaic.version = 11 : i64} {
  func.func @_gin_kernel(%arg0: i32, %arg1: i32, %arg2: memref<1x1xi32, #tpu.memory_space<smem>>, %arg3: memref<1x1xi32, #tpu.memory_space<smem>>, %arg4: memref<128x128xi8, #tpu.memory_space<vmem>>, %arg5: memref<128x128xi8, #tpu.memory_space<vmem>>, %arg6: memref<128x64xf32, #tpu.memory_space<vmem>>, %arg7: memref<64x256xf32, #tpu.memory_space<vmem>>, %arg8: memref<64x256xf32, #tpu.memory_space<vmem>>, %arg9: memref<1x256xf32, #tpu.memory_space<vmem>>, %arg10: memref<256x64xf32, #tpu.memory_space<vmem>>, %arg11: memref<1x64xf32, #tpu.memory_space<vmem>>, %arg12: memref<128x64xf32, #tpu.memory_space<vmem>>, %arg13: memref<128x64xf32, #tpu.memory_space<vmem>>, %arg14: memref<128x64xf32, #tpu.memory_space<vmem>>) attributes {dimension_semantics = [#tpu.dimension_semantics<parallel>, #tpu.dimension_semantics<arbitrary>], iteration_bounds = array<i64: 1, 1>, scalar_prefetch = 2 : i64, scratch_operands = 2 : i64, tpu.core_type = #tpu.core_type<tc>, window_params = [{transform_indices = @transform_0, window_bounds = array<i64: 128, 128>}, {transform_indices = @transform_1, window_bounds = array<i64: 128, 128>}, {transform_indices = @transform_2, window_bounds = array<i64: 128, 64>}, {pipeline_mode = #tpu.pipeline_mode<synchronous>, transform_indices = @transform_3, window_bounds = array<i64: 64, 256>}, {pipeline_mode = #tpu.pipeline_mode<synchronous>, transform_indices = @transform_4, window_bounds = array<i64: 64, 256>}, {pipeline_mode = #tpu.pipeline_mode<synchronous>, transform_indices = @transform_5, window_bounds = array<i64: 1, 256>}, {pipeline_mode = #tpu.pipeline_mode<synchronous>, transform_indices = @transform_6, window_bounds = array<i64: 256, 64>}, {pipeline_mode = #tpu.pipeline_mode<synchronous>, transform_indices = @transform_7, window_bounds = array<i64: 1, 64>}, {transform_indices = @transform_8, window_bounds = array<i64: 128, 64>}]} {
    %c0_i32 = arith.constant 0 : i32
    %0 = arith.cmpi eq, %arg1, %c0_i32 : i32
    %1 = arith.extui %0 : i1 to i32
    %c0_i32_0 = arith.constant 0 : i32
    %2 = arith.cmpi ne, %1, %c0_i32_0 : i32
    scf.if %2 {
      %cst = arith.constant 0.000000e+00 : f32
      %20 = vector.broadcast %cst : f32 to vector<128x64xf32>
      %c0_8 = arith.constant 0 : index
      %c0_9 = arith.constant 0 : index
      %21 = vector.load %arg13[%c0_8, %c0_9] : memref<128x64xf32, #tpu.memory_space<vmem>>, vector<128x64xf32>
      tpu.vector_store %arg13[%c0_8, %c0_9], %20 {strides = array<i32>} : memref<128x64xf32, #tpu.memory_space<vmem>>, vector<128x64xf32>,
      %cst_10 = arith.constant 0.000000e+00 : f32
      %22 = vector.broadcast %cst_10 : f32 to vector<128x64xf32>
      %c0_11 = arith.constant 0 : index
      %c0_12 = arith.constant 0 : index
      %23 = vector.load %arg14[%c0_11, %c0_12] : memref<128x64xf32, #tpu.memory_space<vmem>>, vector<128x64xf32>
      tpu.vector_store %arg14[%c0_11, %c0_12], %22 {strides = array<i32>} : memref<128x64xf32, #tpu.memory_space<vmem>>, vector<128x64xf32>,
    } else {
    }
    %c0 = arith.constant 0 : index
    %c0_1 = arith.constant 0 : index
    %3 = vector.load %arg6[%c0, %c0_1] : memref<128x64xf32, #tpu.memory_space<vmem>>, vector<128x64xf32>
    %4 = arith.truncf %3 : vector<128x64xf32> to vector<128x64xbf16>
    %5 = arith.index_cast %arg0 : i32 to index
    %6 = arith.index_cast %arg1 : i32 to index
    %7 = memref.load %arg2[%5, %6] : memref<1x1xi32, #tpu.memory_space<smem>>
    %c0_i32_2 = arith.constant 0 : i32
    %8 = arith.cmpi sgt, %7, %c0_i32_2 : i32
    %9 = arith.extui %8 : i1 to i32
    %c0_i32_3 = arith.constant 0 : i32
    %10 = arith.cmpi ne, %9, %c0_i32_3 : i32
    scf.if %10 {
      %c0_8 = arith.constant 0 : index
      %c0_9 = arith.constant 0 : index
      %20 = vector.load %arg13[%c0_8, %c0_9] : memref<128x64xf32, #tpu.memory_space<vmem>>, vector<128x64xf32>
      %c0_10 = arith.constant 0 : index
      %c0_11 = arith.constant 0 : index
      %21 = vector.load %arg4[%c0_10, %c0_11] : memref<128x128xi8, #tpu.memory_space<vmem>>, vector<128x128xi8>
      %22 = arith.sitofp %21 : vector<128x128xi8> to vector<128x128xbf16>
      %cst = arith.constant dense<0.000000e+00> : vector<128x64xf32>
      %23 = tpu.matmul %22, %4, %cst {dimension_numbers = #tpu.dot_dimension_numbers<[1], [0], [0], [1], [0, 0, 1, 1], [], []>} : vector<128x128xbf16>, vector<128x64xbf16>, vector<128x64xf32> -> vector<128x64xf32>
      %24 = arith.addf %20, %23 : vector<128x64xf32>
      %c0_12 = arith.constant 0 : index
      %c0_13 = arith.constant 0 : index
      %25 = vector.load %arg13[%c0_12, %c0_13] : memref<128x64xf32, #tpu.memory_space<vmem>>, vector<128x64xf32>
      tpu.vector_store %arg13[%c0_12, %c0_13], %24 {strides = array<i32>} : memref<128x64xf32, #tpu.memory_space<vmem>>, vector<128x64xf32>,
    } else {
    }
    %11 = arith.index_cast %arg0 : i32 to index
    %12 = arith.index_cast %arg1 : i32 to index
    %13 = memref.load %arg3[%11, %12] : memref<1x1xi32, #tpu.memory_space<smem>>
    %c0_i32_4 = arith.constant 0 : i32
    %14 = arith.cmpi sgt, %13, %c0_i32_4 : i32
    %15 = arith.extui %14 : i1 to i32
    %c0_i32_5 = arith.constant 0 : i32
    %16 = arith.cmpi ne, %15, %c0_i32_5 : i32
    scf.if %16 {
      %c0_8 = arith.constant 0 : index
      %c0_9 = arith.constant 0 : index
      %20 = vector.load %arg14[%c0_8, %c0_9] : memref<128x64xf32, #tpu.memory_space<vmem>>, vector<128x64xf32>
      %c0_10 = arith.constant 0 : index
      %c0_11 = arith.constant 0 : index
      %21 = vector.load %arg5[%c0_10, %c0_11] : memref<128x128xi8, #tpu.memory_space<vmem>>, vector<128x128xi8>
      %22 = arith.sitofp %21 : vector<128x128xi8> to vector<128x128xbf16>
      %cst = arith.constant dense<0.000000e+00> : vector<128x64xf32>
      %23 = tpu.matmul %22, %4, %cst {dimension_numbers = #tpu.dot_dimension_numbers<[1], [0], [0], [1], [0, 0, 1, 1], [], []>} : vector<128x128xbf16>, vector<128x64xbf16>, vector<128x64xf32> -> vector<128x64xf32>
      %24 = arith.addf %20, %23 : vector<128x64xf32>
      %c0_12 = arith.constant 0 : index
      %c0_13 = arith.constant 0 : index
      %25 = vector.load %arg14[%c0_12, %c0_13] : memref<128x64xf32, #tpu.memory_space<vmem>>, vector<128x64xf32>
      tpu.vector_store %arg14[%c0_12, %c0_13], %24 {strides = array<i32>} : memref<128x64xf32, #tpu.memory_space<vmem>>, vector<128x64xf32>,
    } else {
    }
    %c0_i32_6 = arith.constant 0 : i32
    %17 = arith.cmpi eq, %arg1, %c0_i32_6 : i32
    %18 = arith.extui %17 : i1 to i32
    %c0_i32_7 = arith.constant 0 : i32
    %19 = arith.cmpi ne, %18, %c0_i32_7 : i32
    scf.if %19 {
      %c0_8 = arith.constant 0 : index
      %c0_9 = arith.constant 0 : index
      %20 = vector.load %arg13[%c0_8, %c0_9] : memref<128x64xf32, #tpu.memory_space<vmem>>, vector<128x64xf32>
      %c0_10 = arith.constant 0 : index
      %c0_11 = arith.constant 0 : index
      %21 = vector.load %arg7[%c0_10, %c0_11] : memref<64x256xf32, #tpu.memory_space<vmem>>, vector<64x256xf32>
      %cst = arith.constant dense<0.000000e+00> : vector<128x256xf32>
      %22 = tpu.matmul %20, %21, %cst {dimension_numbers = #tpu.dot_dimension_numbers<[1], [0], [0], [1], [0, 0, 1, 1], [], []>} : vector<128x64xf32>, vector<64x256xf32>, vector<128x256xf32> -> vector<128x256xf32>
      %c0_12 = arith.constant 0 : index
      %c0_13 = arith.constant 0 : index
      %23 = vector.load %arg14[%c0_12, %c0_13] : memref<128x64xf32, #tpu.memory_space<vmem>>, vector<128x64xf32>
      %c0_14 = arith.constant 0 : index
      %c0_15 = arith.constant 0 : index
      %24 = vector.load %arg8[%c0_14, %c0_15] : memref<64x256xf32, #tpu.memory_space<vmem>>, vector<64x256xf32>
      %cst_16 = arith.constant dense<0.000000e+00> : vector<128x256xf32>
      %25 = tpu.matmul %23, %24, %cst_16 {dimension_numbers = #tpu.dot_dimension_numbers<[1], [0], [0], [1], [0, 0, 1, 1], [], []>} : vector<128x64xf32>, vector<64x256xf32>, vector<128x256xf32> -> vector<128x256xf32>
      %26 = arith.addf %22, %25 : vector<128x256xf32>
      %c0_17 = arith.constant 0 : index
      %c0_18 = arith.constant 0 : index
      %27 = vector.load %arg9[%c0_17, %c0_18] : memref<1x256xf32, #tpu.memory_space<vmem>>, vector<1x256xf32>
      %28 = vector.broadcast %27 : vector<1x256xf32> to vector<128x256xf32>
      %29 = arith.addf %26, %28 : vector<128x256xf32>
      %cst_19 = arith.constant 0.000000e+00 : f32
      %30 = vector.broadcast %cst_19 : f32 to vector<128x256xf32>
      %31 = arith.maximumf %29, %30 : vector<128x256xf32>
      %c0_20 = arith.constant 0 : index
      %c0_21 = arith.constant 0 : index
      %32 = vector.load %arg10[%c0_20, %c0_21] : memref<256x64xf32, #tpu.memory_space<vmem>>, vector<256x64xf32>
      %cst_22 = arith.constant dense<0.000000e+00> : vector<128x64xf32>
      %33 = tpu.matmul %31, %32, %cst_22 {dimension_numbers = #tpu.dot_dimension_numbers<[1], [0], [0], [1], [0, 0, 1, 1], [], []>} : vector<128x256xf32>, vector<256x64xf32>, vector<128x64xf32> -> vector<128x64xf32>
      %c0_23 = arith.constant 0 : index
      %c0_24 = arith.constant 0 : index
      %34 = vector.load %arg11[%c0_23, %c0_24] : memref<1x64xf32, #tpu.memory_space<vmem>>, vector<1x64xf32>
      %35 = vector.broadcast %34 : vector<1x64xf32> to vector<128x64xf32>
      %36 = arith.addf %33, %35 : vector<128x64xf32>
      %c0_25 = arith.constant 0 : index
      %c0_26 = arith.constant 0 : index
      %37 = vector.load %arg12[%c0_25, %c0_26] : memref<128x64xf32, #tpu.memory_space<vmem>>, vector<128x64xf32>
      tpu.vector_store %arg12[%c0_25, %c0_26], %36 {strides = array<i32>} : memref<128x64xf32, #tpu.memory_space<vmem>>, vector<128x64xf32>,
    } else {
    }
    return
  }
  func.func @transform_0(%arg0: i32, %arg1: i32, %arg2: memref<1x1xi32, #tpu.memory_space<smem>>, %arg3: memref<1x1xi32, #tpu.memory_space<smem>>) -> (i32, i32) {
    %0 = arith.index_cast %arg0 : i32 to index
    %1 = arith.index_cast %arg1 : i32 to index
    %2 = memref.load %arg2[%0, %1] : memref<1x1xi32, #tpu.memory_space<smem>>
    %c0_i32 = arith.constant 0 : i32
    %3 = arith.cmpi sgt, %2, %c0_i32 : i32
    %c0_i32_0 = arith.constant 0 : i32
    %4 = arith.select %3, %arg0, %c0_i32_0 : i32
    %c0_i32_1 = arith.constant 0 : i32
    %5 = arith.select %3, %arg1, %c0_i32_1 : i32
    %c0_i32_2 = arith.constant 0 : i32
    return %4, %5 : i32, i32
  }
  func.func @transform_1(%arg0: i32, %arg1: i32, %arg2: memref<1x1xi32, #tpu.memory_space<smem>>, %arg3: memref<1x1xi32, #tpu.memory_space<smem>>) -> (i32, i32) {
    %0 = arith.index_cast %arg0 : i32 to index
    %1 = arith.index_cast %arg1 : i32 to index
    %2 = memref.load %arg3[%0, %1] : memref<1x1xi32, #tpu.memory_space<smem>>
    %c0_i32 = arith.constant 0 : i32
    %3 = arith.cmpi sgt, %2, %c0_i32 : i32
    %c0_i32_0 = arith.constant 0 : i32
    %4 = arith.select %3, %arg0, %c0_i32_0 : i32
    %c0_i32_1 = arith.constant 0 : i32
    %5 = arith.select %3, %arg1, %c0_i32_1 : i32
    %c0_i32_2 = arith.constant 0 : i32
    return %4, %5 : i32, i32
  }
  func.func @transform_2(%arg0: i32, %arg1: i32, %arg2: memref<1x1xi32, #tpu.memory_space<smem>>, %arg3: memref<1x1xi32, #tpu.memory_space<smem>>) -> (i32, i32) {
    %c0_i32 = arith.constant 0 : i32
    %c0_i32_0 = arith.constant 0 : i32
    return %arg1, %c0_i32 : i32, i32
  }
  func.func @transform_3(%arg0: i32, %arg1: i32, %arg2: memref<1x1xi32, #tpu.memory_space<smem>>, %arg3: memref<1x1xi32, #tpu.memory_space<smem>>) -> (i32, i32) {
    %c0_i32 = arith.constant 0 : i32
    %c0_i32_0 = arith.constant 0 : i32
    %c0_i32_1 = arith.constant 0 : i32
    return %c0_i32, %c0_i32_0 : i32, i32
  }
  func.func @transform_4(%arg0: i32, %arg1: i32, %arg2: memref<1x1xi32, #tpu.memory_space<smem>>, %arg3: memref<1x1xi32, #tpu.memory_space<smem>>) -> (i32, i32) {
    %c0_i32 = arith.constant 0 : i32
    %c0_i32_0 = arith.constant 0 : i32
    %c0_i32_1 = arith.constant 0 : i32
    return %c0_i32, %c0_i32_0 : i32, i32
  }
  func.func @transform_5(%arg0: i32, %arg1: i32, %arg2: memref<1x1xi32, #tpu.memory_space<smem>>, %arg3: memref<1x1xi32, #tpu.memory_space<smem>>) -> (i32, i32) {
    %c0_i32 = arith.constant 0 : i32
    %c0_i32_0 = arith.constant 0 : i32
    %c0_i32_1 = arith.constant 0 : i32
    return %c0_i32, %c0_i32_0 : i32, i32
  }
  func.func @transform_6(%arg0: i32, %arg1: i32, %arg2: memref<1x1xi32, #tpu.memory_space<smem>>, %arg3: memref<1x1xi32, #tpu.memory_space<smem>>) -> (i32, i32) {
    %c0_i32 = arith.constant 0 : i32
    %c0_i32_0 = arith.constant 0 : i32
    %c0_i32_1 = arith.constant 0 : i32
    return %c0_i32, %c0_i32_0 : i32, i32
  }
  func.func @transform_7(%arg0: i32, %arg1: i32, %arg2: memref<1x1xi32, #tpu.memory_space<smem>>, %arg3: memref<1x1xi32, #tpu.memory_space<smem>>) -> (i32, i32) {
    %c0_i32 = arith.constant 0 : i32
    %c0_i32_0 = arith.constant 0 : i32
    %c0_i32_1 = arith.constant 0 : i32
    return %c0_i32, %c0_i32_0 : i32, i32
  }
  func.func @transform_8(%arg0: i32, %arg1: i32, %arg2: memref<1x1xi32, #tpu.memory_space<smem>>, %arg3: memref<1x1xi32, #tpu.memory_space<smem>>) -> (i32, i32) {
    %c0_i32 = arith.constant 0 : i32
    %c0_i32_0 = arith.constant 0 : i32
    return %arg0, %c0_i32 : i32, i32
  }
}

</mosaic_0001>

<bundles_post_ra>
// kernel: tpu_custom_call.1
= control target key start
LH: loop header
LB: loop body
LE: loop exit
PB: predicated region body
PF: predicated region fallthrough
CT: control target
= control target key end

     0   :  { %vm160_vm0 = vcmask 523264   ;;  %v1678_v0 = vmov 0.0   ;;  %s2416_s0 = inlined_call_operand.<no memory space> [shape: s32[1,1], index: 0, kind: input, shape index: {}]   ;;  %s2417_s1 = inlined_call_operand.<no memory space> [shape: s32[1,1], index: 1, kind: input, shape index: {}]   ;;  %s2418_s2 = inlined_call_operand.vmem [shape: s8[128,128], index: 2, kind: input, shape index: {}]   ;;  %s2419_s3 = inlined_call_operand.vmem [shape: s8[128,128], index: 3, kind: input, shape index: {}]   ;;  %s2420_s4 = inlined_call_operand.vmem [shape: f32[128,64], index: 4, kind: input, shape index: {}]   ;;  %s2421_s5 = inlined_call_operand.vmem [shape: f32[64,256], index: 5, kind: input, shape index: {}]   ;;  %s2422_s6 = inlined_call_operand.vmem [shape: f32[64,256], index: 6, kind: input, shape index: {}]   ;;  %s2423_s7 = inlined_call_operand.vmem [shape: f32[1,256], index: 7, kind: input, shape index: {}]   ;;  %s2424_s8 = inlined_call_operand.vmem [shape: f32[256,64], index: 8, kind: input, shape index: {}]   ;;  %s2425_s9 = inlined_call_operand.vmem [shape: f32[1,64], index: 9, kind: input, shape index: {}]   ;;  %s2426_s10 = inlined_call_operand.vmem [shape: f32[128,64], index: 10, kind: output, shape index: {}]  }
   0x1   :  { %16 = sst [smem:[#allocation6]] %s2417_s1  ;;  %161 = vst.msk [vmem:[#allocation2] sm:$0xff] %vm160_vm0, %v1678_v0  ;;  %162 = vst.msk [vmem:[#allocation2 + $0x8] sm:$0xff] %vm160_vm0, %v1678_v0  ;;  %v193_v1 = vld [vmem:[%s2420_s4] sm:$0xff]  ;;  %v194_v2 = vld [vmem:[%s2420_s4 + $0x8] sm:$0xff]  ;;  %p1330_p0 = scmp.le.s32.totalorder %s2416_s0, 0 }
   0x2   :  { %163 = vst.msk [vmem:[#allocation2 + $0x10] sm:$0xff] %vm160_vm0, %v1678_v0  ;;  %164 = vst.msk [vmem:[#allocation2 + $0x18] sm:$0xff] %vm160_vm0, %v1678_v0  ;;  %v195_v3 = vld [vmem:[%s2420_s4 + $0x10] sm:$0xff]  ;;  %v196_v4 = vld [vmem:[%s2420_s4 + $0x18] sm:$0xff]  ;;  %v1819_v7 = vpack.c.bf16 %v194_v2, %v193_v1 }
   0x3   :  { %165 = vst.msk [vmem:[#allocation2 + $0x20] sm:$0xff] %vm160_vm0, %v1678_v0  ;;  %166 = vst.msk [vmem:[#allocation2 + $0x28] sm:$0xff] %vm160_vm0, %v1678_v0  ;;  %v197_v5 = vld [vmem:[%s2420_s4 + $0x20] sm:$0xff]  ;;  %v198_v6 = vld [vmem:[%s2420_s4 + $0x28] sm:$0xff]  ;;  %v1830_v11 = vpack.c.bf16 %v196_v4, %v195_v3 }
   0x4   :  { %167 = vst.msk [vmem:[#allocation2 + $0x30] sm:$0xff] %vm160_vm0, %v1678_v0  ;;  %168 = vst.msk [vmem:[#allocation2 + $0x38] sm:$0xff] %vm160_vm0, %v1678_v0  ;;  %v199_v8 = vld [vmem:[%s2420_s4 + $0x30] sm:$0xff]  ;;  %v200_v9 = vld [vmem:[%s2420_s4 + $0x38] sm:$0xff]  ;;  %v1832_v12 = vpack.c.bf16 %v198_v6, %v197_v5  ;;  %1477 = vmatprep.subr.bf16.mxu0 (!%p1330_p0), %v1819_v7  ;;  %1605 = vmatprep.subr.bf16.mxu1 (!%p1330_p0), %v1819_v7 }
   0x5   :  { %169 = vst.msk [vmem:[#allocation2 + $0x40] sm:$0xff] %vm160_vm0, %v1678_v0  ;;  %170 = vst.msk [vmem:[#allocation2 + $0x48] sm:$0xff] %vm160_vm0, %v1678_v0  ;;  %v201_v10 = vld [vmem:[%s2420_s4 + $0x40] sm:$0xff]  ;;  %v202_v13 = vld [vmem:[%s2420_s4 + $0x48] sm:$0xff]  ;;  %v1843_v16 = vpack.c.bf16 %v200_v9, %v199_v8  ;;  %1478 = vmatpush3.bf16.msra.mxu0 (!%p1330_p0), %v1819_v7  ;;  %1613 = vmatpush3.bf16.msra.mxu1 (!%p1330_p0), %v1819_v7 }
   0x6   :  { %171 = vst.msk [vmem:[#allocation2 + $0x50] sm:$0xff] %vm160_vm0, %v1678_v0  ;;  %172 = vst.msk [vmem:[#allocation2 + $0x58] sm:$0xff] %vm160_vm0, %v1678_v0  ;;  %v203_v14 = vld [vmem:[%s2420_s4 + $0x50] sm:$0xff]  ;;  %v204_v15 = vld [vmem:[%s2420_s4 + $0x58] sm:$0xff]  ;;  %v1854_v20 = vpack.c.bf16 %v202_v13, %v201_v10  ;;  %1479 = vmatprep.subr.bf16.mxu0 (!%p1330_p0), %v1830_v11  ;;  %1606 = vmatprep.subr.bf16.mxu1 (!%p1330_p0), %v1830_v11 }
   0x7   :  { %173 = vst.msk [vmem:[#allocation2 + $0x60] sm:$0xff] %vm160_vm0, %v1678_v0  ;;  %174 = vst.msk [vmem:[#allocation2 + $0x68] sm:$0xff] %vm160_vm0, %v1678_v0  ;;  %v205_v17 = vld [vmem:[%s2420_s4 + $0x60] sm:$0xff]  ;;  %v206_v18 = vld [vmem:[%s2420_s4 + $0x68] sm:$0xff]  ;;  %v1856_v21 = vpack.c.bf16 %v204_v15, %v203_v14 }
   0x8   :  { %175 = vst.msk [vmem:[#allocation2 + $0x70] sm:$0xff] %vm160_vm0, %v1678_v0  ;;  %176 = vst.msk [vmem:[#allocation2 + $0x78] sm:$0xff] %vm160_vm0, %v1678_v0  ;;  %v207_v19 = vld [vmem:[%s2420_s4 + $0x70] sm:$0xff]  ;;  %v208_v22 = vld [vmem:[%s2420_s4 + $0x78] sm:$0xff]  ;;  %v1861_v23 = vpack.c.bf16 %v206_v18, %v205_v17 }
   0x9   :  { %177 = vst.msk [vmem:[#allocation3] sm:$0xff] %vm160_vm0, %v1678_v0  ;;  %178 = vst.msk [vmem:[#allocation3 + $0x8] sm:$0xff] %vm160_vm0, %v1678_v0  ;;  %v1863_v24 = vpack.c.bf16 %v208_v22, %v207_v19  ;;  %v241_v25 = vld [vmem:[%s2418_s2] sm:$0xff] (!%p1330_p0)  ;;  %v243_v26 = vld [vmem:[%s2418_s2 + $0x10] sm:$0xff] (!%p1330_p0)  ;;  %1480 = vmatpush3.bf16.msra.mxu0 (!%p1330_p0), %v1830_v11  ;;  %1614 = vmatpush3.bf16.msra.mxu1 (!%p1330_p0), %v1830_v11 }
   0xa   :  { %179 = vst.msk [vmem:[#allocation3 + $0x10] sm:$0xff] %vm160_vm0, %v1678_v0  ;;  %180 = vst.msk [vmem:[#allocation3 + $0x18] sm:$0xff] %vm160_vm0, %v1678_v0  ;;  %224 = sbr.rel (%p1330_p0) target bundleno = 262 (0x106), region = 41  ;;  %v245_v27 = vunpack.c.l.s8.bf16 (!%p1330_p0), %v241_v25  ;;  %v249_v28 = vunpack.c.l.s8.bf16 (!%p1330_p0), %v243_v26  ;;  %1481 = vmatprep.subr.bf16.mxu0 (!%p1330_p0), %v1832_v12  ;;  %1607 = vmatprep.subr.bf16.mxu1 (!%p1330_p0), %v1832_v12  ;;  %v242_v29 = vld [vmem:[%s2418_s2 + $0x8] sm:$0xff] (!%p1330_p0)  ;;  %v244_v30 = vld [vmem:[%s2418_s2 + $0x18] sm:$0xff] (!%p1330_p0)  ;;  %v246_v31 = vunpack.c.h.s8.bf16 (!%p1330_p0), %v241_v25  ;;  %v250_v32 = vunpack.c.h.s8.bf16 (!%p1330_p0), %v243_v26 }
   0xb   :  { %181 = vst.msk [vmem:[#allocation3 + $0x20] sm:$0xff] %vm160_vm0, %v1678_v0  ;;  %182 = vst.msk [vmem:[#allocation3 + $0x28] sm:$0xff] %vm160_vm0, %v1678_v0  ;;  %v247_v33 = vunpack.c.l.s8.bf16 (!%p1330_p0), %v242_v29  ;;  %v251_v34 = vunpack.c.l.s8.bf16 (!%p1330_p0), %v244_v30  ;;  %v248_v35 = vunpack.c.h.s8.bf16 (!%p1330_p0), %v242_v29  ;;  %v252_v36 = vunpack.c.h.s8.bf16 (!%p1330_p0), %v244_v30  ;;  %v227_v37 = vld [vmem:[#allocation2 + $0x10] sm:$0xff] (!%p1330_p0)  ;;  %v225_v39 = vld [vmem:[#allocation2] sm:$0xff] (!%p1330_p0) }
   0xc   :  { %183 = vst.msk [vmem:[#allocation3 + $0x30] sm:$0xff] %vm160_vm0, %v1678_v0  ;;  %184 = vst.msk [vmem:[#allocation3 + $0x38] sm:$0xff] %vm160_vm0, %v1678_v0  ;;  %1493 = vmatprep.mubr.bf16.mxu0 (!%p1330_p0), %v245_v27  ;;  %1501 = vmatprep.mubr.bf16.mxu1 (!%p1330_p0), %v249_v28  ;;  %v233_v40 = vld [vmem:[#allocation2 + $0x40] sm:$0xff] (!%p1330_p0)  ;;  %v228_v43 = vld [vmem:[#allocation2 + $0x18] sm:$0xff] (!%p1330_p0) }
   0xd   :  { %185 = vst.msk [vmem:[#allocation3 + $0x40] sm:$0xff] %vm160_vm0, %v1678_v0  ;;  %186 = vst.msk [vmem:[#allocation3 + $0x48] sm:$0xff] %vm160_vm0, %v1678_v0  ;;  %1482 = vmatpush3.bf16.msra.mxu0 (!%p1330_p0), %v1832_v12  ;;  %1615 = vmatpush3.bf16.msra.mxu1 (!%p1330_p0), %v1832_v12  ;;  %v235_v38 = vld [vmem:[#allocation2 + $0x50] sm:$0xff] (!%p1330_p0)  ;;  %v236_v44 = vld [vmem:[#allocation2 + $0x58] sm:$0xff] (!%p1330_p0) }
   0xe   :  { %187 = vst.msk [vmem:[#allocation3 + $0x50] sm:$0xff] %vm160_vm0, %v1678_v0  ;;  %188 = vst.msk [vmem:[#allocation3 + $0x58] sm:$0xff] %vm160_vm0, %v1678_v0  ;;  %1483 = vmatprep.subr.bf16.mxu0 (!%p1330_p0), %v1843_v16  ;;  %1608 = vmatprep.subr.bf16.mxu1 (!%p1330_p0), %v1843_v16  ;;  %v226_v49 = vld [vmem:[#allocation2 + $0x8] sm:$0xff] (!%p1330_p0)  ;;  %v231_v61 = vld [vmem:[#allocation2 + $0x30] sm:$0xff] (!%p1330_p0) }
   0xf   :  { %189 = vst.msk [vmem:[#allocation3 + $0x60] sm:$0xff] %vm160_vm0, %v1678_v0  ;;  %190 = vst.msk [vmem:[#allocation3 + $0x68] sm:$0xff] %vm160_vm0, %v1678_v0  ;;  %v234_v50 = vld [vmem:[#allocation2 + $0x48] sm:$0xff] (!%p1330_p0)  ;;  %v239_v62 = vld [vmem:[#allocation2 + $0x70] sm:$0xff] (!%p1330_p0) }
  0x10   :  { %191 = vst.msk [vmem:[#allocation3 + $0x70] sm:$0xff] %vm160_vm0, %v1678_v0  ;;  %192 = vst.msk [vmem:[#allocation3 + $0x78] sm:$0xff] %vm160_vm0, %v1678_v0  ;;  %v229_v63 = vld [vmem:[#allocation2 + $0x20] sm:$0xff] (!%p1330_p0)  ;;  %v232_v4 = vld [vmem:[#allocation2 + $0x38] sm:$0xff] (!%p1330_p0) }
  0x11   :  { %1484 = vmatpush3.bf16.msra.mxu0 %v1843_v16  ;;  %1616 = vmatpush3.bf16.msra.mxu1 %v1843_v16  ;;  %v237_v1 = vld [vmem:[#allocation2 + $0x60] sm:$0xff]  ;;  %v240_v5 = vld [vmem:[#allocation2 + $0x78] sm:$0xff]  ;;  %v230_v13 = vld [vmem:[#allocation2 + $0x28] sm:$0xff] }
  0x12   :  { %1485 = vmatprep.subr.bf16.mxu0 %v1854_v20  ;;  %1609 = vmatprep.subr.bf16.mxu1 %v1854_v20  ;;  %v238_v14 = vld [vmem:[#allocation2 + $0x68] sm:$0xff] }
  0x15   :  { %1486 = vmatpush3.bf16.msra.mxu0 %v1854_v20  ;;  %1617 = vmatpush3.bf16.msra.mxu1 %v1854_v20 }
  0x16   :  { %1487 = vmatprep.subr.bf16.mxu0 %v1856_v21  ;;  %1610 = vmatprep.subr.bf16.mxu1 %v1856_v21 }
  0x19   :  { %1488 = vmatpush3.bf16.msra.mxu0 %v1856_v21  ;;  %1618 = vmatpush3.bf16.msra.mxu1 %v1856_v21 }
  0x1a   :  { %1489 = vmatprep.subr.bf16.mxu0 %v1861_v23  ;;  %1611 = vmatprep.subr.bf16.mxu1 %v1861_v23 }
  0x1d   :  { %1490 = vmatpush3.bf16.msra.mxu0 %v1861_v23  ;;  %1619 = vmatpush3.bf16.msra.mxu1 %v1861_v23 }
  0x1e   :  { %1491 = vmatprep.subr.bf16.mxu0 %v1863_v24  ;;  %1612 = vmatprep.subr.bf16.mxu1 %v1863_v24 }
  0x21   :  { %1492 = vmatpush3.bf16.msra.mxu0 %v1863_v24  ;;  %1620 = vmatpush3.bf16.msra.mxu1 %v1863_v24 }
  0x24   :  { %1494 = vmatmul.mubr.bf16.vlgmr.msra.gmra.mrb[0].mxu0 %v246_v31  ;;  %1502 = vmatmul.mubr.bf16.vlgmr.msra.gmra.mrb[0].mxu1 %v250_v32 }
  0x25   :  { %1497 = vmatprep.mubr.bf16.mxu0 %v247_v33  ;;  %1505 = vmatprep.mubr.bf16.mxu1 %v251_v34 }
  0x2c   :  { %1498 = vmatmul.mubr.bf16.gmra.mrb[4].mxu0 %v248_v35  ;;  %1506 = vmatmul.mubr.bf16.gmra.mrb[4].mxu1 %v252_v36 }
  0xf7   :  { %v1495_v41 = vpop.f32.mrb[0].mxu0  ;;  %v1503_v42 = vpop.f32.mrb[0].mxu1 }
  0xf8   :  { %v352_v45 = vadd.f32 %v1495_v41, %v227_v37  ;;  %v360_v46 = vadd.f32 %v1503_v42, %v235_v38  ;;  %v287_v47 = vpop.f32.mrb[1].mxu0  ;;  %v319_v48 = vpop.f32.mrb[1].mxu1 }
  0xf9   :  { %v350_v51 = vadd.f32 %v287_v47, %v225_v39  ;;  %v358_v52 = vadd.f32 %v319_v48, %v233_v40  ;;  %v1496_v53 = vpop.f32.mrb[2].mxu0  ;;  %v1504_v54 = vpop.f32.mrb[2].mxu1 }
  0xfa   :  { %369 = vst.msk [vmem:[#allocation2 + $0x10] sm:$0xff] %vm160_vm0, %v352_v45  ;;  %377 = vst.msk [vmem:[#allocation2 + $0x50] sm:$0xff] %vm160_vm0, %v360_v46  ;;  %v353_v55 = vadd.f32 %v1496_v53, %v228_v43  ;;  %v361_v56 = vadd.f32 %v1504_v54, %v236_v44  ;;  %v290_v57 = vpop.f32.mrb[3].mxu0  ;;  %v322_v58 = vpop.f32.mrb[3].mxu1 }
  0xfb   :  { %367 = vst.msk [vmem:[#allocation2] sm:$0xff] %vm160_vm0, %v350_v51  ;;  %375 = vst.msk [vmem:[#allocation2 + $0x40] sm:$0xff] %vm160_vm0, %v358_v52  ;;  %v351_v59 = vadd.f32 %v290_v57, %v226_v49  ;;  %v359_v60 = vadd.f32 %v322_v58, %v234_v50 }
  0xfc   :  { %370 = vst.msk [vmem:[#allocation2 + $0x18] sm:$0xff] %vm160_vm0, %v353_v55  ;;  %378 = vst.msk [vmem:[#allocation2 + $0x58] sm:$0xff] %vm160_vm0, %v361_v56 }
  0xfd   :  { %368 = vst.msk [vmem:[#allocation2 + $0x8] sm:$0xff] %vm160_vm0, %v351_v59  ;;  %376 = vst.msk [vmem:[#allocation2 + $0x48] sm:$0xff] %vm160_vm0, %v359_v60 }
  0xff   :  { %v1499_v2 = vpop.f32.mrb[4].mxu0  ;;  %v1507_v3 = vpop.f32.mrb[4].mxu1 }
 0x100   :  { %v356_v6 = vadd.f32 %v1499_v2, %v231_v61  ;;  %v364_v8 = vadd.f32 %v1507_v3, %v239_v62  ;;  %v303_v9 = vpop.f32.mrb[5].mxu0  ;;  %v335_v10 = vpop.f32.mrb[5].mxu1 }
 0x101   :  { %v354_v15 = vadd.f32 %v303_v9, %v229_v63  ;;  %v362_v17 = vadd.f32 %v335_v10, %v237_v1  ;;  %v1500_v18 = vpop.f32.mrb[6].mxu0  ;;  %v1508_v19 = vpop.f32.mrb[6].mxu1 }
 0x102   :  { %373 = vst.msk [vmem:[#allocation2 + $0x30] sm:$0xff] %vm160_vm0, %v356_v6  ;;  %381 = vst.msk [vmem:[#allocation2 + $0x70] sm:$0xff] %vm160_vm0, %v364_v8  ;;  %v357_v22 = vadd.f32 %v1500_v18, %v232_v4  ;;  %v365_v25 = vadd.f32 %v1508_v19, %v240_v5  ;;  %v306_v26 = vpop.f32.mrb[7].mxu0  ;;  %v338_v27 = vpop.f32.mrb[7].mxu1 }
 0x103   :  { %371 = vst.msk [vmem:[#allocation2 + $0x20] sm:$0xff] %vm160_vm0, %v354_v15  ;;  %379 = vst.msk [vmem:[#allocation2 + $0x60] sm:$0xff] %vm160_vm0, %v362_v17  ;;  %v355_v28 = vadd.f32 %v306_v26, %v230_v13  ;;  %v363_v29 = vadd.f32 %v338_v27, %v238_v14 }
 0x104   :  { %374 = vst.msk [vmem:[#allocation2 + $0x38] sm:$0xff] %vm160_vm0, %v357_v22  ;;  %382 = vst.msk [vmem:[#allocation2 + $0x78] sm:$0xff] %vm160_vm0, %v365_v25 }
 0x105   :  { %372 = vst.msk [vmem:[#allocation2 + $0x28] sm:$0xff] %vm160_vm0, %v355_v28  ;;  %380 = vst.msk [vmem:[#allocation2 + $0x68] sm:$0xff] %vm160_vm0, %v363_v29 }
 0x106 PF:  { %s383_s2 = sld [smem:[#allocation6]] }
 0x10c   :  { %p1331_p1 = scmp.le.s32.totalorder %s383_s2, 0 }
 0x10d   :  { %1509 = vmatprep.subr.bf16.mxu0 (!%p1331_p1), %v1819_v7  ;;  %1621 = vmatprep.subr.bf16.mxu1 (!%p1331_p1), %v1819_v7  ;;  %v404_v30 = vld [vmem:[%s2419_s3] sm:$0xff] (!%p1331_p1)  ;;  %v406_v31 = vld [vmem:[%s2419_s3 + $0x10] sm:$0xff] (!%p1331_p1)  ;;  %v391_v41 = vld [vmem:[#allocation3 + $0x18] sm:$0xff] (!%p1331_p1) }
 0x10e   :  { %387 = sbr.rel (%p1331_p1) target bundleno = 527 (0x20f), region = 45  ;;  %1510 = vmatpush3.bf16.msra.mxu0 (!%p1331_p1), %v1819_v7  ;;  %1629 = vmatpush3.bf16.msra.mxu1 (!%p1331_p1), %v1819_v7  ;;  %v408_v32 = vunpack.c.l.s8.bf16 (!%p1331_p1), %v404_v30  ;;  %v412_v33 = vunpack.c.l.s8.bf16 (!%p1331_p1), %v406_v31  ;;  %v405_v7 = vld [vmem:[%s2419_s3 + $0x8] sm:$0xff] (!%p1331_p1)  ;;  %v390_v35 = vld [vmem:[#allocation3 + $0x10] sm:$0xff] (!%p1331_p1)  ;;  %v388_v37 = vld [vmem:[#allocation3] sm:$0xff] (!%p1331_p1) }
 0x10f   :  { %1511 = vmatprep.subr.bf16.mxu0 (!%p1331_p1), %v1830_v11  ;;  %1622 = vmatprep.subr.bf16.mxu1 (!%p1331_p1), %v1830_v11  ;;  %v398_v36 = vld [vmem:[#allocation3 + $0x50] sm:$0xff] (!%p1331_p1)  ;;  %v396_v38 = vld [vmem:[#allocation3 + $0x40] sm:$0xff] (!%p1331_p1)  ;;  %v399_v42 = vld [vmem:[#allocation3 + $0x58] sm:$0xff] (!%p1331_p1) }
 0x110   :  { %1525 = vmatprep.mubr.bf16.mxu0 (!%p1331_p1), %v408_v32  ;;  %1533 = vmatprep.mubr.bf16.mxu1 (!%p1331_p1), %v412_v33  ;;  %v389_v46 = vld [vmem:[#allocation3 + $0x8] sm:$0xff] (!%p1331_p1)  ;;  %v394_v58 = vld [vmem:[#allocation3 + $0x30] sm:$0xff] (!%p1331_p1)  ;;  %v392_v60 = vld [vmem:[#allocation3 + $0x20] sm:$0xff] (!%p1331_p1) }
 0x111   :  { %v397_v47 = vld [vmem:[#allocation3 + $0x48] sm:$0xff] (!%p1331_p1)  ;;  %v402_v59 = vld [vmem:[#allocation3 + $0x70] sm:$0xff] (!%p1331_p1)  ;;  %v400_v61 = vld [vmem:[#allocation3 + $0x60] sm:$0xff] (!%p1331_p1) }
 0x112   :  { %1512 = vmatpush3.bf16.msra.mxu0 (!%p1331_p1), %v1830_v11  ;;  %1630 = vmatpush3.bf16.msra.mxu1 (!%p1331_p1), %v1830_v11  ;;  %v407_v11 = vld [vmem:[%s2419_s3 + $0x18] sm:$0xff] (!%p1331_p1)  ;;  %v393_v8 = vld [vmem:[#allocation3 + $0x28] sm:$0xff] (!%p1331_p1) }
 0x113   :  { %1513 = vmatprep.subr.bf16.mxu0 (!%p1331_p1), %v1832_v12  ;;  %1623 = vmatprep.subr.bf16.mxu1 (!%p1331_p1), %v1832_v12  ;;  %v415_v34 = vunpack.c.h.s8.bf16 (!%p1331_p1), %v407_v11  ;;  %v395_v1 = vld [vmem:[#allocation3 + $0x38] sm:$0xff] (!%p1331_p1)  ;;  %v401_v9 = vld [vmem:[#allocation3 + $0x68] sm:$0xff] (!%p1331_p1) }
 0x114   :  { %v403_v2 = vld [vmem:[#allocation3 + $0x78] sm:$0xff] (!%p1331_p1) }
 0x116   :  { %1514 = vmatpush3.bf16.msra.mxu0 %v1832_v12  ;;  %1631 = vmatpush3.bf16.msra.mxu1 %v1832_v12  ;;  %v409_v12 = vunpack.c.h.s8.bf16 %v404_v30 }
 0x117   :  { %1515 = vmatprep.subr.bf16.mxu0 %v1843_v16  ;;  %1624 = vmatprep.subr.bf16.mxu1 %v1843_v16 }
 0x11a   :  { %1516 = vmatpush3.bf16.msra.mxu0 %v1843_v16  ;;  %1632 = vmatpush3.bf16.msra.mxu1 %v1843_v16  ;;  %v413_v16 = vunpack.c.h.s8.bf16 %v406_v31 }
 0x11b   :  { %1517 = vmatprep.subr.bf16.mxu0 %v1854_v20  ;;  %1625 = vmatprep.subr.bf16.mxu1 %v1854_v20 }
 0x11e   :  { %1518 = vmatpush3.bf16.msra.mxu0 %v1854_v20  ;;  %1633 = vmatpush3.bf16.msra.mxu1 %v1854_v20  ;;  %v410_v20 = vunpack.c.l.s8.bf16 %v405_v7 }
 0x11f   :  { %1519 = vmatprep.subr.bf16.mxu0 %v1856_v21  ;;  %1626 = vmatprep.subr.bf16.mxu1 %v1856_v21 }
 0x122   :  { %1520 = vmatpush3.bf16.msra.mxu0 %v1856_v21  ;;  %1634 = vmatpush3.bf16.msra.mxu1 %v1856_v21  ;;  %v414_v21 = vunpack.c.l.s8.bf16 %v407_v11 }
 0x123   :  { %1521 = vmatprep.subr.bf16.mxu0 %v1861_v23  ;;  %1627 = vmatprep.subr.bf16.mxu1 %v1861_v23 }
 0x126   :  { %1522 = vmatpush3.bf16.msra.mxu0 %v1861_v23  ;;  %1635 = vmatpush3.bf16.msra.mxu1 %v1861_v23  ;;  %v411_v23 = vunpack.c.h.s8.bf16 %v405_v7 }
 0x127   :  { %1523 = vmatprep.subr.bf16.mxu0 %v1863_v24  ;;  %1628 = vmatprep.subr.bf16.mxu1 %v1863_v24 }
 0x12a   :  { %1524 = vmatpush3.bf16.msra.mxu0 %v1863_v24  ;;  %1636 = vmatpush3.bf16.msra.mxu1 %v1863_v24 }
 0x12d   :  { %1526 = vmatmul.mubr.bf16.vlgmr.msra.gmra.mrb[0].mxu0 %v409_v12  ;;  %1534 = vmatmul.mubr.bf16.vlgmr.msra.gmra.mrb[0].mxu1 %v413_v16 }
 0x12e   :  { %1529 = vmatprep.mubr.bf16.mxu0 %v410_v20  ;;  %1537 = vmatprep.mubr.bf16.mxu1 %v414_v21 }
 0x135   :  { %1530 = vmatmul.mubr.bf16.gmra.mrb[4].mxu0 %v411_v23  ;;  %1538 = vmatmul.mubr.bf16.gmra.mrb[4].mxu1 %v415_v34 }
 0x200   :  { %v1527_v39 = vpop.f32.mrb[0].mxu0  ;;  %v1535_v40 = vpop.f32.mrb[0].mxu1 }
 0x201   :  { %v515_v43 = vadd.f32 %v1527_v39, %v390_v35  ;;  %v523_v24 = vadd.f32 %v1535_v40, %v398_v36  ;;  %v450_v44 = vpop.f32.mrb[1].mxu0  ;;  %v482_v45 = vpop.f32.mrb[1].mxu1 }
 0x202   :  { %v513_v48 = vadd.f32 %v450_v44, %v388_v37  ;;  %v521_v49 = vadd.f32 %v482_v45, %v396_v38  ;;  %v1528_v50 = vpop.f32.mrb[2].mxu0  ;;  %v1536_v51 = vpop.f32.mrb[2].mxu1 }
 0x203   :  { %532 = vst.msk [vmem:[#allocation3 + $0x10] sm:$0xff] %vm160_vm0, %v515_v43  ;;  %540 = vst.msk [vmem:[#allocation3 + $0x50] sm:$0xff] %vm160_vm0, %v523_v24  ;;  %v516_v52 = vadd.f32 %v1528_v50, %v391_v41  ;;  %v524_v53 = vadd.f32 %v1536_v51, %v399_v42  ;;  %v453_v54 = vpop.f32.mrb[3].mxu0  ;;  %v485_v55 = vpop.f32.mrb[3].mxu1 }
 0x204   :  { %530 = vst.msk [vmem:[#allocation3] sm:$0xff] %vm160_vm0, %v513_v48  ;;  %538 = vst.msk [vmem:[#allocation3 + $0x40] sm:$0xff] %vm160_vm0, %v521_v49  ;;  %v514_v56 = vadd.f32 %v453_v54, %v389_v46  ;;  %v522_v57 = vadd.f32 %v485_v55, %v397_v47 }
 0x205   :  { %533 = vst.msk [vmem:[#allocation3 + $0x18] sm:$0xff] %vm160_vm0, %v516_v52  ;;  %541 = vst.msk [vmem:[#allocation3 + $0x58] sm:$0xff] %vm160_vm0, %v524_v53 }
 0x206   :  { %531 = vst.msk [vmem:[#allocation3 + $0x8] sm:$0xff] %vm160_vm0, %v514_v56  ;;  %539 = vst.msk [vmem:[#allocation3 + $0x48] sm:$0xff] %vm160_vm0, %v522_v57 }
 0x208   :  { %v1531_v62 = vpop.f32.mrb[4].mxu0  ;;  %v1539_v63 = vpop.f32.mrb[4].mxu1 }
 0x209   :  { %v519_v3 = vadd.f32 %v1531_v62, %v394_v58  ;;  %v527_v4 = vadd.f32 %v1539_v63, %v402_v59  ;;  %v466_v5 = vpop.f32.mrb[5].mxu0  ;;  %v498_v6 = vpop.f32.mrb[5].mxu1 }
 0x20a   :  { %v517_v10 = vadd.f32 %v466_v5, %v392_v60  ;;  %v525_v13 = vadd.f32 %v498_v6, %v400_v61  ;;  %v1532_v14 = vpop.f32.mrb[6].mxu0  ;;  %v1540_v15 = vpop.f32.mrb[6].mxu1 }
 0x20b   :  { %536 = vst.msk [vmem:[#allocation3 + $0x30] sm:$0xff] %vm160_vm0, %v519_v3  ;;  %544 = vst.msk [vmem:[#allocation3 + $0x70] sm:$0xff] %vm160_vm0, %v527_v4  ;;  %v520_v17 = vadd.f32 %v1532_v14, %v395_v1  ;;  %v528_v18 = vadd.f32 %v1540_v15, %v403_v2  ;;  %v469_v19 = vpop.f32.mrb[7].mxu0  ;;  %v501_v22 = vpop.f32.mrb[7].mxu1 }
 0x20c   :  { %534 = vst.msk [vmem:[#allocation3 + $0x20] sm:$0xff] %vm160_vm0, %v517_v10  ;;  %542 = vst.msk [vmem:[#allocation3 + $0x60] sm:$0xff] %vm160_vm0, %v525_v13  ;;  %v518_v25 = vadd.f32 %v469_v19, %v393_v8  ;;  %v526_v26 = vadd.f32 %v501_v22, %v401_v9 }
 0x20d   :  { %537 = vst.msk [vmem:[#allocation3 + $0x38] sm:$0xff] %vm160_vm0, %v520_v17  ;;  %545 = vst.msk [vmem:[#allocation3 + $0x78] sm:$0xff] %vm160_vm0, %v528_v18 }
 0x20e   :  { %535 = vst.msk [vmem:[#allocation3 + $0x28] sm:$0xff] %vm160_vm0, %v518_v25  ;;  %543 = vst.msk [vmem:[#allocation3 + $0x68] sm:$0xff] %vm160_vm0, %v526_v26 }
 0x20f PF:  { %v598_v27 = vld [vmem:[%s2422_s6 + $0x8] sm:$0xff]  ;;  %v600_v28 = vld [vmem:[%s2422_s6 + $0x18] sm:$0xff]  ;;  %v597_v29 = vld [vmem:[%s2422_s6] sm:$0xff]  ;;  %726 = vmatprep.mubr.f32.mxu0 %v1678_v0  ;;  %774 = vmatprep.mubr.f32.mxu1 %v1678_v0 }
 0x210   :  { %v1541_v30 = vpack.c.bf16 %v600_v28, %v598_v27  ;;  %v599_v31 = vld [vmem:[%s2422_s6 + $0x10] sm:$0xff]  ;;  %v602_v32 = vld [vmem:[%s2422_s6 + $0x28] sm:$0xff]  ;;  %v604_v33 = vld [vmem:[%s2422_s6 + $0x38] sm:$0xff] }
 0x211   :  { %v1543_v7 = vpack.c.bf16 %v599_v31, %v597_v29  ;;  %v1545_v11 = vpack.c.bf16 %v604_v33, %v602_v32  ;;  %v601_v12 = vld [vmem:[%s2422_s6 + $0x20] sm:$0xff]  ;;  %v603_v16 = vld [vmem:[%s2422_s6 + $0x30] sm:$0xff]  ;;  %v606_v20 = vld [vmem:[%s2422_s6 + $0x48] sm:$0xff] }
 0x212   :  { %1542 = vmatprep.subr.bf16.mxu0 %v1541_v30  ;;  %v608_v21 = vld [vmem:[%s2422_s6 + $0x58] sm:$0xff]  ;;  %1637 = vmatprep.subr.bf16.mxu1 %v1541_v30  ;;  %v1547_v23 = vpack.c.bf16 %v603_v16, %v601_v12  ;;  %v605_v35 = vld [vmem:[%s2422_s6 + $0x40] sm:$0xff]  ;;  %v607_v36 = vld [vmem:[%s2422_s6 + $0x50] sm:$0xff] }
 0x213   :  { %1544 = vmatpush1.bf16.msra.mxu0 %v1543_v7  ;;  %1641 = vmatpush1.bf16.msra.mxu1 %v1543_v7  ;;  %v1549_v34 = vpack.c.bf16 %v608_v21, %v606_v20  ;;  %v610_v37 = vld [vmem:[%s2422_s6 + $0x68] sm:$0xff]  ;;  %v612_v38 = vld [vmem:[%s2422_s6 + $0x78] sm:$0xff]  ;;  %v1551_v39 = vpack.c.bf16 %v607_v36, %v605_v35  ;;  %v609_v41 = vld [vmem:[%s2422_s6 + $0x60] sm:$0xff] }
 0x214   :  { %1546 = vmatprep.subr.bf16.mxu0 %v1545_v11  ;;  %1638 = vmatprep.subr.bf16.mxu1 %v1545_v11  ;;  %v1553_v40 = vpack.c.bf16 %v612_v38, %v610_v37  ;;  %v611_v42 = vld [vmem:[%s2422_s6 + $0x70] sm:$0xff]  ;;  %v566_v43 = vld [vmem:[%s2421_s5 + $0x8] sm:$0xff]  ;;  %v568_v24 = vld [vmem:[%s2421_s5 + $0x18] sm:$0xff] }
 0x215   :  { %v1555_v44 = vpack.c.bf16 %v611_v42, %v609_v41  ;;  %v1557_v45 = vpack.c.bf16 %v568_v24, %v566_v43  ;;  %v565_v46 = vld [vmem:[%s2421_s5] sm:$0xff]  ;;  %v567_v47 = vld [vmem:[%s2421_s5 + $0x10] sm:$0xff]  ;;  %v570_v48 = vld [vmem:[%s2421_s5 + $0x28] sm:$0xff] }
 0x216   :  { %v572_v49 = vld [vmem:[%s2421_s5 + $0x38] sm:$0xff]  ;;  %v581_v50 = vld [vmem:[#allocation3] sm:$0xff]  ;;  %v1559_v51 = vpack.c.bf16 %v567_v47, %v565_v46  ;;  %v571_v55 = vld [vmem:[%s2421_s5 + $0x30] sm:$0xff] }
 0x217   :  { %1548 = vmatpush1.bf16.msra.mxu0 %v1547_v23  ;;  %1642 = vmatpush1.bf16.msra.mxu1 %v1547_v23  ;;  %v589_v52 = vld [vmem:[#allocation3 + $0x40] sm:$0xff]  ;;  %v1561_v53 = vpack.c.bf16 %v572_v49, %v570_v48  ;;  %v574_v56 = vld [vmem:[%s2421_s5 + $0x48] sm:$0xff]  ;;  %v576_v57 = vld [vmem:[%s2421_s5 + $0x58] sm:$0xff] }
 0x218   :  { %1550 = vmatprep.subr.bf16.mxu0 %v1549_v34  ;;  %1639 = vmatprep.subr.bf16.mxu1 %v1549_v34  ;;  %v569_v54 = vld [vmem:[%s2421_s5 + $0x20] sm:$0xff]  ;;  %v582_v58 = vld [vmem:[#allocation3 + $0x8] sm:$0xff]  ;;  %v1565_v62 = vpack.c.bf16 %v576_v57, %v574_v56  ;;  %v575_v63 = vld [vmem:[%s2421_s5 + $0x50] sm:$0xff] }
 0x219   :  { %v1563_v59 = vpack.c.bf16 %v571_v55, %v569_v54  ;;  %v573_v60 = vld [vmem:[%s2421_s5 + $0x40] sm:$0xff]  ;;  %v590_v61 = vld [vmem:[#allocation3 + $0x48] sm:$0xff]  ;;  %v580_v4 = vld [vmem:[%s2421_s5 + $0x78] sm:$0xff] }
 0x21a   :  { %v1124_v1 = vld [vmem:[%s2424_s8 + $0x80] sm:$0xff]  ;;  %v1125_v2 = vld [vmem:[%s2424_s8 + $0x88] sm:$0xff]  ;;  %v583_v9 = vld [vmem:[#allocation3 + $0x10] sm:$0xff]  ;;  %v1567_v10 = vpack.c.bf16 %v575_v63, %v573_v60 }
 0x21b   :  { %1552 = vmatpush1.bf16.msra.mxu0 %v1551_v39  ;;  %1643 = vmatpush1.bf16.msra.mxu1 %v1551_v39  ;;  %v578_v3 = vld [vmem:[%s2421_s5 + $0x68] sm:$0xff]  ;;  %v1573_v5 = vpack.c.bf16 %v1125_v2, %v1124_v1  ;;  %v1108_v6 = vld [vmem:[%s2424_s8] sm:$0xff]  ;;  %v591_v13 = vld [vmem:[#allocation3 + $0x50] sm:$0xff] }
 0x21c   :  { %1554 = vmatprep.subr.bf16.mxu0 %v1553_v40  ;;  %1640 = vmatprep.subr.bf16.mxu1 %v1553_v40  ;;  %v1109_v8 = vld [vmem:[%s2424_s8 + $0x8] sm:$0xff]  ;;  %v1569_v14 = vpack.c.bf16 %v580_v4, %v578_v3  ;;  %v577_v15 = vld [vmem:[%s2421_s5 + $0x60] sm:$0xff]  ;;  %v579_v17 = vld [vmem:[%s2421_s5 + $0x70] sm:$0xff] }
 0x21d   :  { %v1575_v18 = vpack.c.bf16 %v1109_v8, %v1108_v6  ;;  %v1126_v19 = vld [vmem:[%s2424_s8 + $0x90] sm:$0xff]  ;;  %v1127_v22 = vld [vmem:[%s2424_s8 + $0x98] sm:$0xff]  ;;  %v1571_v28 = vpack.c.bf16 %v579_v17, %v577_v15  ;;  %v1128_v32 = vld [vmem:[%s2424_s8 + $0xa0] sm:$0xff] }
 0x21e   :  { %v1110_v25 = vld [vmem:[%s2424_s8 + $0x10] sm:$0xff]  ;;  %v1111_v26 = vld [vmem:[%s2424_s8 + $0x18] sm:$0xff]  ;;  %v1577_v30 = vpack.c.bf16 %v1127_v22, %v1126_v19  ;;  %v1129_v33 = vld [vmem:[%s2424_s8 + $0xa8] sm:$0xff] }
 0x21f   :  { %1556 = vmatpush1.bf16.msra.mxu0 %v1555_v44  ;;  %1644 = vmatpush1.bf16.msra.mxu1 %v1555_v44  ;;  %v584_v27 = vld [vmem:[#allocation3 + $0x18] sm:$0xff]  ;;  %v1579_v31 = vpack.c.bf16 %v1111_v26, %v1110_v25  ;;  %v1112_v7 = vld [vmem:[%s2424_s8 + $0x20] sm:$0xff]  ;;  %v1113_v11 = vld [vmem:[%s2424_s8 + $0x28] sm:$0xff]  ;;  %v1581_v20 = vpack.c.bf16 %v1129_v33, %v1128_v32 }
 0x220   :  { %1558 = vmatprep.subr.bf16.mxu0 %v1557_v45  ;;  %1574 = vmatprep.subr.bf16.mxu1 %v1573_v5  ;;  %v592_v29 = vld [vmem:[#allocation3 + $0x58] sm:$0xff]  ;;  %v585_v12 = vld [vmem:[#allocation3 + $0x20] sm:$0xff]  ;;  %v1583_v21 = vpack.c.bf16 %v1113_v11, %v1112_v7  ;;  %v1130_v23 = vld [vmem:[%s2424_s8 + $0xb0] sm:$0xff] }
 0x221   :  { %v593_v16 = vld [vmem:[#allocation3 + $0x60] sm:$0xff]  ;;  %v1131_v34 = vld [vmem:[%s2424_s8 + $0xb8] sm:$0xff]  ;;  %v1114_v35 = vld [vmem:[%s2424_s8 + $0x30] sm:$0xff] }
 0x222   :  { %1332 = vmatmul.mubr.msk.f32.vlgmr.msra.gmra.mrb[0].mxu0 %vm160_vm0, %v581_v50  ;;  %1340 = vmatmul.mubr.msk.f32.vlgmr.msra.gmra.mrb[0].mxu1 %vm160_vm0, %v589_v52  ;;  %v1115_v36 = vld [vmem:[%s2424_s8 + $0x38] sm:$0xff]  ;;  %v586_v37 = vld [vmem:[#allocation3 + $0x28] sm:$0xff]  ;;  %v1585_v39 = vpack.c.bf16 %v1131_v34, %v1130_v23  ;;  %v1132_v41 = vld [vmem:[%s2424_s8 + $0xc0] sm:$0xff] }
 0x223   :  { %1560 = vmatpush1.bf16.msra.mxu0 %v1559_v51  ;;  %732 = vmatprep.mubr.f32.mxu0 %v1678_v0  ;;  %v594_v38 = vld [vmem:[#allocation3 + $0x68] sm:$0xff]  ;;  %v1587_v40 = vpack.c.bf16 %v1115_v36, %v1114_v35  ;;  %v1116_v43 = vld [vmem:[%s2424_s8 + $0x40] sm:$0xff]  ;;  %v587_v44 = vld [vmem:[#allocation3 + $0x30] sm:$0xff] }
 0x224   :  { %1562 = vmatprep.subr.bf16.mxu0 %v1561_v53  ;;  %780 = vmatprep.mubr.f32.mxu1 %v1678_v0  ;;  %v1133_v42 = vld [vmem:[%s2424_s8 + $0xc8] sm:$0xff]  ;;  %v595_v45 = vld [vmem:[#allocation3 + $0x70] sm:$0xff]  ;;  %v1135_v48 = vld [vmem:[%s2424_s8 + $0xd8] sm:$0xff] }
 0x225   :  { %1576 = vmatpush3.bf16.msra.mxu1 %v1575_v18  ;;  %v1117_v24 = vld [vmem:[%s2424_s8 + $0x48] sm:$0xff]  ;;  %v1589_v46 = vpack.c.bf16 %v1133_v42, %v1132_v41  ;;  %v1134_v47 = vld [vmem:[%s2424_s8 + $0xd0] sm:$0xff]  ;;  %v588_v50 = vld [vmem:[#allocation3 + $0x38] sm:$0xff] }
 0x226   :  { %1333 = vmatmul.mubr.msk.f32.gmra.mrb[2].mxu0 %vm160_vm0, %v582_v58  ;;  %1341 = vmatmul.mubr.msk.f32.gmra.mrb[2].mxu1 %vm160_vm0, %v590_v61  ;;  %v1591_v49 = vpack.c.bf16 %v1117_v24, %v1116_v43  ;;  %v1118_v51 = vld [vmem:[%s2424_s8 + $0x50] sm:$0xff]  ;;  %v1119_v52 = vld [vmem:[%s2424_s8 + $0x58] sm:$0xff]  ;;  %v1593_v54 = vpack.c.bf16 %v1135_v48, %v1134_v47  ;;  %v1136_v55 = vld [vmem:[%s2424_s8 + $0xe0] sm:$0xff] }
 0x227   :  { %738 = vmatprep.mubr.f32.mxu0 %v1678_v0  ;;  %1564 = vmatpush1.bf16.msra.mxu0 %v1563_v59  ;;  %v596_v53 = vld [vmem:[#allocation3 + $0x78] sm:$0xff]  ;;  %v1137_v56 = vld [vmem:[%s2424_s8 + $0xe8] sm:$0xff]  ;;  %v1595_v57 = vpack.c.bf16 %v1119_v52, %v1118_v51  ;;  %v549_v59 = vld [vmem:[#allocation2] sm:$0xff] }
 0x228   :  { %1566 = vmatprep.subr.bf16.mxu0 %v1565_v62  ;;  %786 = vmatprep.mubr.f32.mxu1 %v1678_v0  ;;  %v1597_v58 = vpack.c.bf16 %v1137_v56, %v1136_v55  ;;  %v550_v60 = vld [vmem:[#allocation2 + $0x8] sm:$0xff]  ;;  %v551_v61 = vld [vmem:[#allocation2 + $0x10] sm:$0xff]  ;;  %v552_v62 = vld [vmem:[#allocation2 + $0x18] sm:$0xff] }
 0x229   :  { %1578 = vmatprep.subr.bf16.mxu1 %v1577_v30  ;;  %v553_v63 = vld [vmem:[#allocation2 + $0x20] sm:$0xff]  ;;  %v554_v1 = vld [vmem:[#allocation2 + $0x28] sm:$0xff]  ;;  %v555_v2 = vld [vmem:[#allocation2 + $0x30] sm:$0xff] }
 0x22a   :  { %1334 = vmatmul.mubr.msk.f32.gmra.mrb[4].mxu0 %vm160_vm0, %v583_v9  ;;  %1342 = vmatmul.mubr.msk.f32.gmra.mrb[4].mxu1 %vm160_vm0, %v591_v13  ;;  %v556_v3 = vld [vmem:[#allocation2 + $0x38] sm:$0xff]  ;;  %v557_v4 = vld [vmem:[#allocation2 + $0x40] sm:$0xff]  ;;  %v558_v5 = vld [vmem:[#allocation2 + $0x48] sm:$0xff] }
 0x22b   :  { %744 = vmatprep.mubr.f32.mxu0 %v1678_v0  ;;  %1568 = vmatpush1.bf16.msra.mxu0 %v1567_v10  ;;  %v559_v6 = vld [vmem:[#allocation2 + $0x50] sm:$0xff]  ;;  %v560_v8 = vld [vmem:[#allocation2 + $0x58] sm:$0xff]  ;;  %v561_v9 = vld [vmem:[#allocation2 + $0x60] sm:$0xff] }
 0x22c   :  { %1570 = vmatprep.subr.bf16.mxu0 %v1569_v14  ;;  %792 = vmatprep.mubr.f32.mxu1 %v1678_v0  ;;  %v562_v10 = vld [vmem:[#allocation2 + $0x68] sm:$0xff]  ;;  %v563_v13 = vld [vmem:[#allocation2 + $0x70] sm:$0xff]  ;;  %v564_v14 = vld [vmem:[#allocation2 + $0x78] sm:$0xff] }
 0x22d   :  { %1580 = vmatpush3.bf16.msra.mxu1 %v1579_v31  ;;  %v1120_v15 = vld [vmem:[%s2424_s8 + $0x60] sm:$0xff]  ;;  %v1121_v17 = vld [vmem:[%s2424_s8 + $0x68] sm:$0xff]  ;;  %v1138_v19 = vld [vmem:[%s2424_s8 + $0xf0] sm:$0xff] }
 0x22e   :  { %1335 = vmatmul.mubr.msk.f32.gmra.mrb[6].mxu0 %vm160_vm0, %v584_v27  ;;  %1343 = vmatmul.mubr.msk.f32.gmra.mrb[6].mxu1 %vm160_vm0, %v592_v29  ;;  %v1599_v18 = vpack.c.bf16 %v1121_v17, %v1120_v15  ;;  %v1122_v25 = vld [vmem:[%s2424_s8 + $0x70] sm:$0xff]  ;;  %v1123_v26 = vld [vmem:[%s2424_s8 + $0x78] sm:$0xff] }
 0x22f   :  { %750 = vmatprep.mubr.f32.mxu0 %v1678_v0  ;;  %1572 = vmatpush1.bf16.msra.mxu0 %v1571_v28  ;;  %v1603_v27 = vpack.c.bf16 %v1123_v26, %v1122_v25 }
 0x230   :  { %798 = vmatprep.mubr.f32.mxu1 %v1678_v0  ;;  %1582 = vmatprep.subr.bf16.mxu1 %v1581_v20 }
 0x231   :  { %1584 = vmatpush3.bf16.msra.mxu1 %v1583_v21 }
 0x232   :  { %1336 = vmatmul.mubr.msk.f32.gmra.mrb[8].mxu0 %vm160_vm0, %v585_v12  ;;  %1344 = vmatmul.mubr.msk.f32.gmra.mrb[8].mxu1 %vm160_vm0, %v593_v16  ;;  %v1034_v16 = vlaneseq }
 0x233   :  { %756 = vmatprep.mubr.f32.mxu0 %v1678_v0  ;;  %804 = vmatprep.mubr.f32.mxu1 %v1678_v0 }
 0x234   :  { %1586 = vmatprep.subr.bf16.mxu1 %v1585_v39  ;;  %v1035_v23 = vshrl.u32 %v1034_v16, 7 }
 0x235   :  { %1588 = vmatpush3.bf16.msra.mxu1 %v1587_v40 }
 0x236   :  { %1337 = vmatmul.mubr.msk.f32.gmra.mrb[10].mxu0 %vm160_vm0, %v586_v37  ;;  %1345 = vmatmul.mubr.msk.f32.gmra.mrb[10].mxu1 %vm160_vm0, %v594_v38  ;;  %v1036_v36 = vsub.s32 0, %v1035_v23  ;;  %v1032_v38 = vld [vmem:[%s2423_s7] sm:$0x3]  ;;  %v1040_v39 = vsub.s32 1, %v1035_v23 }
 0x237   :  { %762 = vmatprep.mubr.f32.mxu0 %v1678_v0  ;;  %810 = vmatprep.mubr.f32.mxu1 %v1678_v0 }
 0x238   :  { %1590 = vmatprep.subr.bf16.mxu1 %v1589_v46  ;;  %v2277_v41 = vrot.slane %v1032_v38, %v1036_v36  ;;  %v2281_v43 = vrot.slane %v1032_v38, %v1040_v39 }
 0x239   :  { %1592 = vmatpush3.bf16.msra.mxu1 %v1591_v49 }
 0x23a   :  { %1338 = vmatmul.mubr.msk.f32.gmra.mrb[12].mxu0 %vm160_vm0, %v587_v44  ;;  %1346 = vmatmul.mubr.msk.f32.gmra.mrb[12].mxu1 %vm160_vm0, %v595_v45 }
 0x23b   :  { %768 = vmatprep.mubr.f32.mxu0 %v1678_v0  ;;  %816 = vmatprep.mubr.f32.mxu1 %v1678_v0 }
 0x23c   :  { %1594 = vmatprep.subr.bf16.mxu1 %v1593_v54 }
 0x23d   :  { %1596 = vmatpush3.bf16.msra.mxu1 %v1595_v57 }
 0x23e   :  { %1339 = vmatmul.mubr.msk.f32.gmra.mrb[14].mxu0 %vm160_vm0, %v588_v50  ;;  %1347 = vmatmul.mubr.msk.f32.gmra.mrb[14].mxu1 %vm160_vm0, %v596_v53 }
 0x23f   :  { %935 = vmatprep.mubr.f32.mxu0 %v1678_v0  ;;  %1598 = vmatprep.subr.bf16.mxu1 %v1597_v58 }
 0x241   :  { %1600 = vmatpush3.bf16.msra.mxu1 %v1599_v18 }
 0x242   :  { %1348 = vmatmul.mubr.msk.f32.vlgmr.msra.gmra.mrb[0].mxu0 %vm160_vm0, %v549_v59 }
 0x243   :  { %941 = vmatprep.mubr.f32.mxu0 %v1678_v0 }
 0x246   :  { %1349 = vmatmul.mubr.msk.f32.gmra.mrb[2].mxu0 %vm160_vm0, %v550_v60 }
 0x247   :  { %947 = vmatprep.mubr.f32.mxu0 %v1678_v0 }
 0x24a   :  { %1350 = vmatmul.mubr.msk.f32.gmra.mrb[4].mxu0 %vm160_vm0, %v551_v61 }
 0x24b   :  { %953 = vmatprep.mubr.f32.mxu0 %v1678_v0 }
 0x24e   :  { %1351 = vmatmul.mubr.msk.f32.gmra.mrb[6].mxu0 %vm160_vm0, %v552_v62 }
 0x24f   :  { %959 = vmatprep.mubr.f32.mxu0 %v1678_v0 }
 0x252   :  { %1352 = vmatmul.mubr.msk.f32.gmra.mrb[8].mxu0 %vm160_vm0, %v553_v63 }
 0x253   :  { %965 = vmatprep.mubr.f32.mxu0 %v1678_v0 }
 0x256   :  { %1353 = vmatmul.mubr.msk.f32.gmra.mrb[10].mxu0 %vm160_vm0, %v554_v1 }
 0x257   :  { %971 = vmatprep.mubr.f32.mxu0 %v1678_v0 }
 0x25a   :  { %1354 = vmatmul.mubr.msk.f32.gmra.mrb[12].mxu0 %vm160_vm0, %v555_v2 }
 0x25b   :  { %977 = vmatprep.mubr.f32.mxu0 %v1678_v0 }
 0x25e   :  { %1355 = vmatmul.mubr.msk.f32.gmra.mrb[14].mxu0 %vm160_vm0, %v556_v3 }
 0x25f   :  { %983 = vmatprep.mubr.f32.mxu0 %v1678_v0 }
 0x262   :  { %1356 = vmatmul.mubr.msk.f32.gmra.mrb[16].mxu0 %vm160_vm0, %v557_v4 }
 0x263   :  { %989 = vmatprep.mubr.f32.mxu0 %v1678_v0 }
 0x266   :  { %1357 = vmatmul.mubr.msk.f32.gmra.mrb[18].mxu0 %vm160_vm0, %v558_v5 }
 0x267   :  { %995 = vmatprep.mubr.f32.mxu0 %v1678_v0 }
 0x26a   :  { %1358 = vmatmul.mubr.msk.f32.gmra.mrb[20].mxu0 %vm160_vm0, %v559_v6 }
 0x26b   :  { %1001 = vmatprep.mubr.f32.mxu0 %v1678_v0 }
 0x26e   :  { %1359 = vmatmul.mubr.msk.f32.gmra.mrb[22].mxu0 %vm160_vm0, %v560_v8 }
 0x26f   :  { %1007 = vmatprep.mubr.f32.mxu0 %v1678_v0 }
 0x272   :  { %1360 = vmatmul.mubr.msk.f32.gmra.mrb[24].mxu0 %vm160_vm0, %v561_v9 }
 0x273   :  { %1013 = vmatprep.mubr.f32.mxu0 %v1678_v0 }
 0x276   :  { %1361 = vmatmul.mubr.msk.f32.gmra.mrb[26].mxu0 %vm160_vm0, %v562_v10 }
 0x277   :  { %1019 = vmatprep.mubr.f32.mxu0 %v1678_v0 }
 0x27a   :  { %1362 = vmatmul.mubr.msk.f32.gmra.mrb[28].mxu0 %vm160_vm0, %v563_v13 }
 0x27b   :  { %1025 = vmatprep.mubr.f32.mxu0 %v1678_v0  ;;  %v1139_v0 = vld [vmem:[%s2424_s8 + $0xf8] sm:$0xff] }
 0x27c   :  { %v1601_v22 = vpack.c.bf16 %v1139_v0, %v1138_v19 }
 0x27e   :  { %1363 = vmatmul.mubr.msk.f32.gmra.mrb[30].mxu0 %vm160_vm0, %v564_v14  ;;  %1602 = vmatprep.subr.bf16.mxu1 %v1601_v22 }
 0x27f   :  { %1604 = vmatpush3.bf16.msra.mxu1 %v1603_v27 }
 0x2f5   :  { %v2244_v28 = vpop.f32.mrb[0].mxu1 }
 0x2f6   :  { %v2246_v29 = vpop.f32.mrb[1].mxu1 }
 0x2f9   :  { %v2248_v30 = vpop.f32.mrb[2].mxu1 }
 0x2fa   :  { %v2250_v31 = vpop.f32.mrb[3].mxu1 }
 0x2fd   :  { %v2252_v32 = vpop.f32.mrb[4].mxu1 }
 0x2fe   :  { %v2254_v33 = vpop.f32.mrb[5].mxu1 }
 0x301   :  { %v2256_v7 = vpop.f32.mrb[6].mxu1 }
 0x302   :  { %v2258_v11 = vpop.f32.mrb[7].mxu1 }
 0x305   :  { %v2260_v12 = vpop.f32.mrb[8].mxu1 }
 0x306   :  { %v2262_v20 = vpop.f32.mrb[9].mxu1 }
 0x309   :  { %v2264_v21 = vpop.f32.mrb[10].mxu1 }
 0x30a   :  { %v2266_v34 = vpop.f32.mrb[11].mxu1 }
 0x30d   :  { %v2268_v35 = vpop.f32.mrb[12].mxu1 }
 0x30e   :  { %v2270_v37 = vpop.f32.mrb[13].mxu1 }
 0x311   :  { %v2275_v40 = vpop.f32.mrb[14].mxu1 }
 0x312   :  { %v2279_v42 = vpop.f32.mrb[15].mxu1 }
 0x315   :  { %v937_v24 = vpop.f32.mrb[0].mxu0 }
 0x316   :  { %v1044_v44 = vadd.f32 %v2277_v41, %v937_v24  ;;  %v939_v45 = vpop.f32.mrb[1].mxu0 }
 0x317   :  { %v1045_v46 = vadd.f32 %v2281_v43, %v939_v45 }
 0x318   :  { %v1076_v49 = vmax.f32 %v1044_v44, 0.0 }
 0x319   :  { %v1077_v47 = vmax.f32 %v1045_v46, 0.0  ;;  %v943_v48 = vpop.f32.mrb[2].mxu0 }
 0x31a   :  { %v1046_v50 = vadd.f32 %v2277_v41, %v943_v48  ;;  %v945_v51 = vpop.f32.mrb[3].mxu0 }
 0x31b   :  { %v1047_v52 = vadd.f32 %v2281_v43, %v945_v51  ;;  %1211 = vmatprep.mubr.f32.mxu1 %v1077_v47 }
 0x31c   :  { %1212 = vmatmul.mubr.f32.vlgmr.msra.gmra.mrb[16].mxu1 %v1076_v49  ;;  %v1078_v55 = vmax.f32 %v1046_v50, 0.0 }
 0x31d   :  { %v1079_v53 = vmax.f32 %v1047_v52, 0.0  ;;  %v949_v54 = vpop.f32.mrb[4].mxu0 }
 0x31e   :  { %v1048_v56 = vadd.f32 %v2277_v41, %v949_v54  ;;  %v951_v57 = vpop.f32.mrb[5].mxu0 }
 0x31f   :  { %v1049_v58 = vadd.f32 %v2281_v43, %v951_v57  ;;  %1216 = vmatprep.mubr.f32.mxu1 %v1079_v53 }
 0x320   :  { %1217 = vmatmul.mubr.f32.gmra.mrb[18].mxu1 %v1078_v55  ;;  %v1080_v61 = vmax.f32 %v1048_v56, 0.0 }
 0x321   :  { %v1081_v59 = vmax.f32 %v1049_v58, 0.0  ;;  %v955_v60 = vpop.f32.mrb[6].mxu0 }
 0x322   :  { %v1050_v62 = vadd.f32 %v2277_v41, %v955_v60  ;;  %v957_v63 = vpop.f32.mrb[7].mxu0 }
 0x323   :  { %v1051_v1 = vadd.f32 %v2281_v43, %v957_v63  ;;  %1221 = vmatprep.mubr.f32.mxu1 %v1081_v59 }
 0x324   :  { %1222 = vmatmul.mubr.f32.gmra.mrb[20].mxu1 %v1080_v61  ;;  %v1082_v4 = vmax.f32 %v1050_v62, 0.0 }
 0x325   :  { %v1083_v2 = vmax.f32 %v1051_v1, 0.0  ;;  %v961_v3 = vpop.f32.mrb[8].mxu0 }
 0x326   :  { %v1052_v5 = vadd.f32 %v2277_v41, %v961_v3  ;;  %v963_v6 = vpop.f32.mrb[9].mxu0 }
 0x327   :  { %v1053_v8 = vadd.f32 %v2281_v43, %v963_v6  ;;  %1226 = vmatprep.mubr.f32.mxu1 %v1083_v2 }
 0x328   :  { %1227 = vmatmul.mubr.f32.gmra.mrb[22].mxu1 %v1082_v4  ;;  %v1084_v13 = vmax.f32 %v1052_v5, 0.0 }
 0x329   :  { %v1085_v9 = vmax.f32 %v1053_v8, 0.0  ;;  %v967_v10 = vpop.f32.mrb[10].mxu0 }
 0x32a   :  { %v1054_v14 = vadd.f32 %v2277_v41, %v967_v10  ;;  %v969_v15 = vpop.f32.mrb[11].mxu0 }
 0x32b   :  { %v1055_v17 = vadd.f32 %v2281_v43, %v969_v15  ;;  %1231 = vmatprep.mubr.f32.mxu1 %v1085_v9 }
 0x32c   :  { %1232 = vmatmul.mubr.f32.gmra.mrb[24].mxu1 %v1084_v13  ;;  %v1086_v0 = vmax.f32 %v1054_v14, 0.0 }
 0x32d   :  { %v1087_v18 = vmax.f32 %v1055_v17, 0.0  ;;  %v973_v19 = vpop.f32.mrb[12].mxu0 }
 0x32e   :  { %v1056_v22 = vadd.f32 %v2277_v41, %v973_v19  ;;  %v975_v25 = vpop.f32.mrb[13].mxu0 }
 0x32f   :  { %v1057_v26 = vadd.f32 %v2281_v43, %v975_v25  ;;  %1236 = vmatprep.mubr.f32.mxu1 %v1087_v18 }
 0x330   :  { %1237 = vmatmul.mubr.f32.gmra.mrb[26].mxu1 %v1086_v0  ;;  %v1088_v23 = vmax.f32 %v1056_v22, 0.0 }
 0x331   :  { %v1089_v27 = vmax.f32 %v1057_v26, 0.0  ;;  %v979_v16 = vpop.f32.mrb[14].mxu0 }
 0x332   :  { %v1058_v36 = vadd.f32 %v2277_v41, %v979_v16  ;;  %v981_v38 = vpop.f32.mrb[15].mxu0 }
 0x333   :  { %v1059_v39 = vadd.f32 %v2281_v43, %v981_v38  ;;  %1241 = vmatprep.mubr.f32.mxu1 %v1089_v27 }
 0x334   :  { %1242 = vmatmul.mubr.f32.gmra.mrb[28].mxu1 %v1088_v23  ;;  %v1090_v45 = vmax.f32 %v1058_v36, 0.0 }
 0x335   :  { %v1091_v24 = vmax.f32 %v1059_v39, 0.0  ;;  %v985_v44 = vpop.f32.mrb[16].mxu0 }
 0x336   :  { %v986_v46 = vadd.f32 %v985_v44, %v2244_v28  ;;  %v987_v47 = vpop.f32.mrb[17].mxu0 }
 0x337   :  { %v988_v48 = vadd.f32 %v987_v47, %v2246_v29  ;;  %1246 = vmatprep.mubr.f32.mxu1 %v1091_v24 }
 0x338   :  { %v1060_v49 = vadd.f32 %v2277_v41, %v986_v46  ;;  %1247 = vmatmul.mubr.f32.gmra.mrb[30].mxu1 %v1090_v45 }
 0x339   :  { %v1061_v50 = vadd.f32 %v2281_v43, %v988_v48  ;;  %v991_v51 = vpop.f32.mrb[18].mxu0 }
 0x33a   :  { %v992_v52 = vadd.f32 %v991_v51, %v2248_v30  ;;  %v993_v53 = vpop.f32.mrb[19].mxu0  ;;  %v1092_v56 = vmax.f32 %v1060_v49, 0.0 }
 0x33b   :  { %v1093_v54 = vmax.f32 %v1061_v50, 0.0  ;;  %v994_v55 = vadd.f32 %v993_v53, %v2250_v31 }
 0x33c   :  { %v1062_v57 = vadd.f32 %v2277_v41, %v992_v52 }
 0x33d   :  { %v1063_v28 = vadd.f32 %v2281_v43, %v994_v55  ;;  %v997_v58 = vpop.f32.mrb[20].mxu0  ;;  %1251 = vmatprep.mubr.f32.mxu1 %v1093_v54 }
 0x33e   :  { %v998_v29 = vadd.f32 %v997_v58, %v2252_v32  ;;  %v999_v59 = vpop.f32.mrb[21].mxu0  ;;  %1252 = vmatmul.mubr.f32.gmra.mrb[32].mxu1 %v1092_v56  ;;  %v1094_v62 = vmax.f32 %v1062_v57, 0.0 }
 0x33f   :  { %v1095_v60 = vmax.f32 %v1063_v28, 0.0  ;;  %v1000_v61 = vadd.f32 %v999_v59, %v2254_v33 }
 0x340   :  { %v1064_v30 = vadd.f32 %v2277_v41, %v998_v29 }
 0x341   :  { %v1065_v63 = vadd.f32 %v2281_v43, %v1000_v61  ;;  %v1003_v31 = vpop.f32.mrb[22].mxu0  ;;  %1256 = vmatprep.mubr.f32.mxu1 %v1095_v60 }
 0x342   :  { %v1004_v1 = vadd.f32 %v1003_v31, %v2256_v7  ;;  %v1005_v2 = vpop.f32.mrb[23].mxu0  ;;  %1257 = vmatmul.mubr.f32.gmra.mrb[34].mxu1 %v1094_v62  ;;  %v1096_v32 = vmax.f32 %v1064_v30, 0.0 }
 0x343   :  { %v1097_v3 = vmax.f32 %v1065_v63, 0.0  ;;  %v1006_v4 = vadd.f32 %v1005_v2, %v2258_v11 }
 0x344   :  { %v1066_v5 = vadd.f32 %v2277_v41, %v1004_v1 }
 0x345   :  { %v1067_v6 = vadd.f32 %v2281_v43, %v1006_v4  ;;  %v1009_v33 = vpop.f32.mrb[24].mxu0  ;;  %1261 = vmatprep.mubr.f32.mxu1 %v1097_v3 }
 0x346   :  { %v1010_v8 = vadd.f32 %v1009_v33, %v2260_v12  ;;  %v1011_v9 = vpop.f32.mrb[25].mxu0  ;;  %1262 = vmatmul.mubr.f32.gmra.mrb[36].mxu1 %v1096_v32  ;;  %v1098_v7 = vmax.f32 %v1066_v5, 0.0 }
 0x347   :  { %v1099_v10 = vmax.f32 %v1067_v6, 0.0  ;;  %v1012_v13 = vadd.f32 %v1011_v9, %v2262_v20 }
 0x348   :  { %v1068_v14 = vadd.f32 %v2277_v41, %v1010_v8 }
 0x349   :  { %v1069_v15 = vadd.f32 %v2281_v43, %v1012_v13  ;;  %v1015_v11 = vpop.f32.mrb[26].mxu0  ;;  %1266 = vmatprep.mubr.f32.mxu1 %v1099_v10 }
 0x34a   :  { %v1016_v17 = vadd.f32 %v1015_v11, %v2264_v21  ;;  %v1017_v18 = vpop.f32.mrb[27].mxu0  ;;  %1267 = vmatmul.mubr.f32.gmra.mrb[38].mxu1 %v1098_v7  ;;  %v1100_v12 = vmax.f32 %v1068_v14, 0.0 }
 0x34b   :  { %v1101_v19 = vmax.f32 %v1069_v15, 0.0  ;;  %v1018_v0 = vadd.f32 %v1017_v18, %v2266_v34 }
 0x34c   :  { %v1070_v22 = vadd.f32 %v2277_v41, %v1016_v17 }
 0x34d   :  { %v1071_v25 = vadd.f32 %v2281_v43, %v1018_v0  ;;  %v1021_v20 = vpop.f32.mrb[28].mxu0  ;;  %1271 = vmatprep.mubr.f32.mxu1 %v1101_v19 }
 0x34e   :  { %v1022_v26 = vadd.f32 %v1021_v20, %v2268_v35  ;;  %v1023_v27 = vpop.f32.mrb[29].mxu0  ;;  %1272 = vmatmul.mubr.f32.gmra.mrb[40].mxu1 %v1100_v12  ;;  %v1102_v21 = vmax.f32 %v1070_v22, 0.0 }
 0x34f   :  { %v1103_v16 = vmax.f32 %v1071_v25, 0.0  ;;  %v1024_v23 = vadd.f32 %v1023_v27, %v2270_v37 }
 0x350   :  { %v1072_v36 = vadd.f32 %v2277_v41, %v1022_v26 }
 0x351   :  { %v1073_v38 = vadd.f32 %v2281_v43, %v1024_v23  ;;  %v1027_v34 = vpop.f32.mrb[30].mxu0  ;;  %1276 = vmatprep.mubr.f32.mxu1 %v1103_v16 }
 0x352   :  { %v1028_v39 = vadd.f32 %v1027_v34, %v2275_v40  ;;  %v1029_v24 = vpop.f32.mrb[31].mxu0  ;;  %1277 = vmatmul.mubr.f32.gmra.mrb[42].mxu1 %v1102_v21  ;;  %v1104_v35 = vmax.f32 %v1072_v36, 0.0  ;;  %v2334_v40 = vld [vmem:[%s2425_s9] ss:$0 sm:$0xff] }
 0x353   :  { %v1105_v44 = vmax.f32 %v1073_v38, 0.0  ;;  %v1030_v45 = vadd.f32 %v1029_v24, %v2279_v42 }
 0x354   :  { %v1074_v46 = vadd.f32 %v2277_v41, %v1028_v39 }
 0x355   :  { %v1075_v47 = vadd.f32 %v2281_v43, %v1030_v45  ;;  %1281 = vmatprep.mubr.f32.mxu1 %v1105_v44 }
 0x356   :  { %1282 = vmatmul.mubr.f32.gmra.mrb[44].mxu1 %v1104_v35  ;;  %v1106_v48 = vmax.f32 %v1074_v46, 0.0 }
 0x357   :  { %v1107_v37 = vmax.f32 %v1075_v47, 0.0 }
 0x359   :  { %1286 = vmatprep.mubr.f32.mxu1 %v1107_v37 }
 0x35a   :  { %1287 = vmatmul.mubr.f32.gmra.mrb[46].mxu1 %v1106_v48 }
 0x3ef   :  { %v1429_v49 = vpop.f32.mrb[16].mxu1 }
 0x3f0   :  { %v1430_v50 = vpop.f32.mrb[17].mxu1 }
 0x3f1   :  { %v1431_v51 = vadd.f32 %v1430_v50, %v1429_v49 }
 0x3f3   :  { %v1214_v42 = vadd.f32 %v1431_v51, %v2334_v40  ;;  %v1432_v52 = vpop.f32.mrb[18].mxu1 }
 0x3f4   :  { %v1433_v41 = vpop.f32.mrb[19].mxu1 }
 0x3f5   :  { %1292 = vst.msk [vmem:[%s2426_s10] sm:$0xff] %vm160_vm0, %v1214_v42  ;;  %v1434_v43 = vadd.f32 %v1433_v41, %v1432_v52 }
 0x3f7   :  { %v1219_v53 = vadd.f32 %v1434_v43, %v2334_v40  ;;  %v1435_v54 = vpop.f32.mrb[20].mxu1 }
 0x3f8   :  { %v1436_v55 = vpop.f32.mrb[21].mxu1 }
 0x3f9   :  { %1293 = vst.msk [vmem:[%s2426_s10 + $0x8] sm:$0xff] %vm160_vm0, %v1219_v53  ;;  %v1437_v56 = vadd.f32 %v1436_v55, %v1435_v54 }
 0x3fb   :  { %v1224_v57 = vadd.f32 %v1437_v56, %v2334_v40  ;;  %v1438_v28 = vpop.f32.mrb[22].mxu1 }
 0x3fc   :  { %v1439_v58 = vpop.f32.mrb[23].mxu1 }
 0x3fd   :  { %1294 = vst.msk [vmem:[%s2426_s10 + $0x10] sm:$0xff] %vm160_vm0, %v1224_v57  ;;  %v1440_v29 = vadd.f32 %v1439_v58, %v1438_v28 }
 0x3ff   :  { %v1229_v59 = vadd.f32 %v1440_v29, %v2334_v40  ;;  %v1441_v60 = vpop.f32.mrb[24].mxu1 }
 0x400   :  { %v1442_v61 = vpop.f32.mrb[25].mxu1 }
 0x401   :  { %1295 = vst.msk [vmem:[%s2426_s10 + $0x18] sm:$0xff] %vm160_vm0, %v1229_v59  ;;  %v1443_v62 = vadd.f32 %v1442_v61, %v1441_v60 }
 0x403   :  { %v1234_v30 = vadd.f32 %v1443_v62, %v2334_v40  ;;  %v1444_v63 = vpop.f32.mrb[26].mxu1 }
 0x404   :  { %v1445_v31 = vpop.f32.mrb[27].mxu1 }
 0x405   :  { %1296 = vst.msk [vmem:[%s2426_s10 + $0x20] sm:$0xff] %vm160_vm0, %v1234_v30  ;;  %v1446_v1 = vadd.f32 %v1445_v31, %v1444_v63 }
 0x407   :  { %v1239_v2 = vadd.f32 %v1446_v1, %v2334_v40  ;;  %v1447_v3 = vpop.f32.mrb[28].mxu1 }
 0x408   :  { %v1448_v4 = vpop.f32.mrb[29].mxu1 }
 0x409   :  { %1297 = vst.msk [vmem:[%s2426_s10 + $0x28] sm:$0xff] %vm160_vm0, %v1239_v2  ;;  %v1449_v32 = vadd.f32 %v1448_v4, %v1447_v3 }
 0x40b   :  { %v1244_v5 = vadd.f32 %v1449_v32, %v2334_v40  ;;  %v1450_v6 = vpop.f32.mrb[30].mxu1 }
 0x40c   :  { %v1451_v33 = vpop.f32.mrb[31].mxu1 }
 0x40d   :  { %1298 = vst.msk [vmem:[%s2426_s10 + $0x30] sm:$0xff] %vm160_vm0, %v1244_v5  ;;  %v1452_v8 = vadd.f32 %v1451_v33, %v1450_v6 }
 0x40f   :  { %v1249_v9 = vadd.f32 %v1452_v8, %v2334_v40 }
 0x411   :  { %1299 = vst.msk [vmem:[%s2426_s10 + $0x38] sm:$0xff] %vm160_vm0, %v1249_v9  ;;  %v1453_v10 = vpop.f32.mrb[32].mxu1 }
 0x412   :  { %v1454_v13 = vpop.f32.mrb[33].mxu1 }
 0x413   :  { %v1455_v7 = vadd.f32 %v1454_v13, %v1453_v10 }
 0x415   :  { %v1254_v14 = vadd.f32 %v1455_v7, %v2334_v40  ;;  %v1456_v15 = vpop.f32.mrb[34].mxu1 }
 0x416   :  { %v1457_v11 = vpop.f32.mrb[35].mxu1 }
 0x417   :  { %1300 = vst.msk [vmem:[%s2426_s10 + $0x40] sm:$0xff] %vm160_vm0, %v1254_v14  ;;  %v1458_v17 = vadd.f32 %v1457_v11, %v1456_v15 }
 0x419   :  { %v1259_v18 = vadd.f32 %v1458_v17, %v2334_v40  ;;  %v1459_v19 = vpop.f32.mrb[36].mxu1 }
 0x41a   :  { %v1460_v0 = vpop.f32.mrb[37].mxu1 }
 0x41b   :  { %1301 = vst.msk [vmem:[%s2426_s10 + $0x48] sm:$0xff] %vm160_vm0, %v1259_v18  ;;  %v1461_v12 = vadd.f32 %v1460_v0, %v1459_v19 }
 0x41d   :  { %v1264_v22 = vadd.f32 %v1461_v12, %v2334_v40  ;;  %v1462_v25 = vpop.f32.mrb[38].mxu1 }
 0x41e   :  { %v1463_v20 = vpop.f32.mrb[39].mxu1 }
 0x41f   :  { %1302 = vst.msk [vmem:[%s2426_s10 + $0x50] sm:$0xff] %vm160_vm0, %v1264_v22  ;;  %v1464_v26 = vadd.f32 %v1463_v20, %v1462_v25 }
 0x421   :  { %v1269_v27 = vadd.f32 %v1464_v26, %v2334_v40  ;;  %v1465_v16 = vpop.f32.mrb[40].mxu1 }
 0x422   :  { %v1466_v23 = vpop.f32.mrb[41].mxu1 }
 0x423   :  { %1303 = vst.msk [vmem:[%s2426_s10 + $0x58] sm:$0xff] %vm160_vm0, %v1269_v27  ;;  %v1467_v21 = vadd.f32 %v1466_v23, %v1465_v16 }
 0x425   :  { %v1274_v36 = vadd.f32 %v1467_v21, %v2334_v40  ;;  %v1468_v38 = vpop.f32.mrb[42].mxu1 }
 0x426   :  { %v1469_v34 = vpop.f32.mrb[43].mxu1 }
 0x427   :  { %1304 = vst.msk [vmem:[%s2426_s10 + $0x60] sm:$0xff] %vm160_vm0, %v1274_v36  ;;  %v1470_v39 = vadd.f32 %v1469_v34, %v1468_v38 }
 0x429   :  { %v1279_v24 = vadd.f32 %v1470_v39, %v2334_v40  ;;  %v1471_v44 = vpop.f32.mrb[44].mxu1 }
 0x42a   :  { %v1472_v45 = vpop.f32.mrb[45].mxu1 }
 0x42b   :  { %1305 = vst.msk [vmem:[%s2426_s10 + $0x68] sm:$0xff] %vm160_vm0, %v1279_v24  ;;  %v1473_v35 = vadd.f32 %v1472_v45, %v1471_v44 }
 0x42d   :  { %v1284_v46 = vadd.f32 %v1473_v35, %v2334_v40  ;;  %v1474_v47 = vpop.f32.mrb[46].mxu1 }
 0x42e   :  { %v1475_v37 = vpop.f32.mrb[47].mxu1 }
 0x42f   :  { %1306 = vst.msk [vmem:[%s2426_s10 + $0x70] sm:$0xff] %vm160_vm0, %v1284_v46  ;;  %v1476_v48 = vadd.f32 %v1475_v37, %v1474_v47 }
 0x431   :  { %v1289_v49 = vadd.f32 %v1476_v48, %v2334_v40 }
 0x433   :  { %1307 = vst.msk [vmem:[%s2426_s10 + $0x78] sm:$0xff] %vm160_vm0, %v1289_v49 }

</bundles_post_ra>
